<compile_context>
chip_gen: v7x
topology: tpu7x:2x2x1
jax: 0.10.0
libtpu: 0.0.40
codegen_flags: <defaults>
</compile_context>

<pallas_src>
import math

import jax
import jax.numpy as jnp
from jax import lax
from jax.experimental import pallas as pl
from jax.experimental.pallas import tpu as pltpu


def _make_mha_kernel(n_heads, d_depth, with_attn):
    def kernel(q_ref, k_ref, v_ref, bias_ref, wq_ref, wk_ref, wv_ref, wc_ref, *rest):
        # Per-grid-step (b, qi) views:
        #   q_ref                : (1, TQ, D) bf16   query rows of this q-block
        #   k_ref, v_ref         : (1, L, D)  bf16   full keys/values of this batch elem
        #   bias_ref             : (TQ, L)    f32    precomputed additive mask bias
        #   wq/wk/wv/wc_ref      : (D, D)     bf16   full projection matrices (Wq pre-scaled)
        #   out_ref              : (1, TQ, D)        attn_outputs tile
        #   attn_ref (optional)  : (1, H, TQ, L)     attention weights for this q-block
        #   kp_ref / vp_ref      : (L, D) bf16       persistent per-batch K/V projections
        #   ctx_ref              : (TQ, D) f32       combine_heads slab
        if with_attn:
            out_ref, attn_ref, kp_ref, vp_ref, ctx_ref = rest
        else:
            out_ref, kp_ref, vp_ref, ctx_ref = rest
            attn_ref = None

        qi = pl.program_id(1)

        # K/V projections for this batch element: one full-width (L, D) @ (D, D) bf16
        # matmul each, computed at the first query block and kept resident in bf16 VMEM
        # scratch for every later query block of the same batch element.
        @pl.when(qi == 0)
        def _():
            kp_ref[...] = jnp.dot(
                k_ref[0], wk_ref[...],
                preferred_element_type=jnp.float32).astype(jnp.bfloat16)
            vp_ref[...] = jnp.dot(
                v_ref[0], wv_ref[...],
                preferred_element_type=jnp.float32).astype(jnp.bfloat16)

        # Q projection, full width; the 1/sqrt(d_depth) scale is folded into Wq.
        qp = jnp.dot(q_ref[0], wq_ref[...],
                     preferred_element_type=jnp.float32).astype(jnp.bfloat16)   # (TQ, D)

        bias = bias_ref[...]                                                     # (TQ, L)

        for h in range(n_heads):                     # static unroll, static lane slices
            sl = slice(h * d_depth, (h + 1) * d_depth)
            qh = qp[:, sl]                           # (TQ, dd) bf16
            kh = kp_ref[:, sl]                       # (L,  dd) bf16
            vh = vp_ref[:, sl]                       # (L,  dd) bf16

            logits = lax.dot_general(qh, kh, (((1,), (1,)), ((), ())),
                                     preferred_element_type=jnp.float32)        # (TQ, L)
            logits = logits + bias

            # Numerically-stable softmax over keys (f32 element-wise math; exact
            # reciprocal of the (TQ, 1) denominator so stored rows sum to 1).
            m = jnp.max(logits, axis=-1, keepdims=True)
            e = jnp.exp(logits - m)
            w = e * (1.0 / jnp.sum(e, axis=-1, keepdims=True))

            if attn_ref is not None:
                attn_ref[0, h] = w.astype(attn_ref.dtype)

            # This head's context written into its lane slice of the combine_heads slab.
            ctx_ref[:, sl] = jnp.dot(w.astype(jnp.bfloat16), vh,
                                     preferred_element_type=jnp.float32)

        # Single full-width output projection (combine_heads slab @ Wc^T), stored once
        # per (b, q-block) as a lane-dense full-D tile.
        out_ref[0] = jnp.dot(ctx_ref[...].astype(jnp.bfloat16), wc_ref[...],
                             preferred_element_type=jnp.float32).astype(out_ref.dtype)

    return kernel


def _pick_q_block(L, D, H, attn_itemsize, vmem_budget_bytes=48 * 1024 * 1024):
    """Largest query-block size from {512, 256, 128, L} whose per-step VMEM fits."""

    def vmem_need(tq):
        n = 0
        n += 2 * tq * D * 2                    # q tile (bf16, double-buffered)
        n += 2 * 2 * L * D * 2                 # k + v full-seq blocks (bf16, 2 bufs each)
        n += 2 * tq * L * 4                    # additive mask-bias tile (f32)
        n += 2 * 4 * D * D * 2                 # 4 weight matrices (bf16)
        n += 2 * tq * D * 4                    # output tile (f32, double-buffered)
        n += 2 * H * tq * L * attn_itemsize    # attention-weights tile (0 if skipped)
        n += 2 * L * D * 2                     # K/V projection scratch (bf16)
        n += tq * D * 4                        # combine_heads slab (f32)
        return n

    for cand in (512, 256, 128):
        if L % cand == 0 and vmem_need(cand) <= vmem_budget_bytes:
            return cand
    return L  # small / irregular sequence lengths: one full-sequence block


def multi_head_attention(v, k, q, wq, wk, wv, wc, *, n_heads, mask=None,
                         neg_infty=-1e9, q_block_size=None,
                         return_attn_weights=True, attn_dtype=jnp.float32):
    """Pallas implementation of MultiHeadAttention.forward(v, k, q, mask).

    v, k, q : (B, L, d_model) float32
    w*      : (d_model, d_model) torch.nn.Linear weights (out, in); y = x @ W.T
    Returns (attn_outputs (B, L, d_model) f32,
             attn_weights (B, H, L, L) attn_dtype or None).
    """
    B, L, D = q.shape
    assert D % n_heads == 0
    dd = D // n_heads
    scale = 1.0 / math.sqrt(float(dd))

    attn_itemsize = jnp.dtype(attn_dtype).itemsize if return_attn_weights else 0
    if q_block_size is None:
        q_block_size = _pick_q_block(L, D, n_heads, attn_itemsize)
    TQ = q_block_size
    assert L % TQ == 0
    n_q_blocks = L // TQ

    # Additive mask bias precomputed on the host: the kernel only adds it.
    # TODO(synk): per-batch masks (B, 1, L, L) with B > 1 are collapsed to one (L, L)
    # pattern, matching the usual (1, 1, L, L) broadcast usage of this module.
    if mask is None:
        mask_bias = jnp.zeros((L, L), dtype=jnp.float32)
    else:
        mask_bias = (jnp.broadcast_to(jnp.asarray(mask, jnp.float32),
                                      (1, 1, L, L))[0, 0] * float(neg_infty))

    # Host glue (not hot path): transpose Linear weights to x@W layout, fold the
    # 1/sqrt(d_depth) scale into Wq, cast weights and activations to bf16 (MXU-native).
    wq_t = (jnp.asarray(wq, jnp.float32).T * scale).astype(jnp.bfloat16)
    wk_t = jnp.asarray(wk, jnp.float32).T.astype(jnp.bfloat16)
    wv_t = jnp.asarray(wv, jnp.float32).T.astype(jnp.bfloat16)
    wc_t = jnp.asarray(wc, jnp.float32).T.astype(jnp.bfloat16)
    q_b = jnp.asarray(q).astype(jnp.bfloat16)
    k_b = jnp.asarray(k).astype(jnp.bfloat16)
    v_b = jnp.asarray(v).astype(jnp.bfloat16)

    grid = (B, n_q_blocks)
    q_spec = pl.BlockSpec((1, TQ, D), lambda b, qi: (b, qi, 0))
    kv_spec = pl.BlockSpec((1, L, D), lambda b, qi: (b, 0, 0))
    bias_spec = pl.BlockSpec((TQ, L), lambda b, qi: (qi, 0))
    w_spec = pl.BlockSpec((D, D), lambda b, qi: (0, 0))

    out_shapes = [jax.ShapeDtypeStruct((B, L, D), jnp.float32)]
    out_specs = [pl.BlockSpec((1, TQ, D), lambda b, qi: (b, qi, 0))]
    if return_attn_weights:
        out_shapes.append(jax.ShapeDtypeStruct((B, n_heads, L, L), attn_dtype))
        out_specs.append(pl.BlockSpec((1, n_heads, TQ, L), lambda b, qi: (b, 0, qi, 0)))

    kernel = _make_mha_kernel(n_heads, dd, return_attn_weights)

    results = pl.pallas_call(
        kernel,
        out_shape=tuple(out_shapes),
        grid_spec=pltpu.PrefetchScalarGridSpec(
            num_scalar_prefetch=0,
            grid=grid,
            in_specs=[q_spec, kv_spec, kv_spec, bias_spec,
                      w_spec, w_spec, w_spec, w_spec],
            out_specs=tuple(out_specs),
            scratch_shapes=[
                pltpu.VMEM((L, D), jnp.bfloat16),   # K projection (per batch, persistent)
                pltpu.VMEM((L, D), jnp.bfloat16),   # V projection (per batch, persistent)
                pltpu.VMEM((TQ, D), jnp.float32),   # combine_heads slab
            ],
        ),
        compiler_params=pltpu.CompilerParams(
            # Batch axis megacore-parallel; q-block axis carries the K/V scratch dep.
            dimension_semantics=("parallel", "arbitrary"),
            # <= v7x physical (64 MiB), well under v5e/v6e's 128 MiB.
            vmem_limit_bytes=64 * 1024 * 1024,
        ),
    )(q_b, k_b, v_b, mask_bias, wq_t, wk_t, wv_t, wc_t)

    if return_attn_weights:
        out, attn = results
        return out, attn
    (out,) = results
    return out, None


def _reference(v, k, q, wq, wk, wv, wc, n_heads, mask=None, neg_infty=-1e9):
    B, L, D = q.shape
    dd = D // n_heads

    def proj(x, w):
        return x @ w.T

    def split(x):
        return x.reshape(B, L, n_heads, dd).transpose(0, 2, 1, 3)

    qh, kh, vh = split(proj(q, wq)), split(proj(k, wk)), split(proj(v, wv))
    logits = jnp.einsum("bhqd,bhkd->bhqk", qh, kh) * (1.0 / math.sqrt(dd))
    if mask is None:
        m = jnp.zeros((1, 1, L, L), jnp.float32)
    else:
        m = mask.astype(jnp.float32)
    logits = logits + m * neg_infty
    w = jax.nn.softmax(logits, axis=-1)
    out = jnp.einsum("bhqk,bhkd->bhqd", w, vh)
    out = out.transpose(0, 2, 1, 3).reshape(B, L, D) @ wc.T
    return out, w


if __name__ == "__main__":
    B, L, D, H = 2, 8, 32, 4

    key = jax.random.PRNGKey(0)
    kq, kk, kv, k1, k2, k3, k4 = jax.random.split(key, 7)

    q_in = jax.random.normal(kq, (B, L, D), jnp.float32)
    k_in = jax.random.normal(kk, (B, L, D), jnp.float32)
    v_in = jax.random.normal(kv, (B, L, D), jnp.float32)

    # Deterministic Linear weights, shape (out, in) like torch.nn.Linear.
    bound = 1.0 / math.sqrt(D)
    wq = jax.random.uniform(k1, (D, D), jnp.float32, -bound, bound)
    wk = jax.random.uniform(k2, (D, D), jnp.float32, -bound, bound)
    wv = jax.random.uniform(k3, (D, D), jnp.float32, -bound, bound)
    wc = jax.random.uniform(k4, (D, D), jnp.float32, -bound, bound)

    # Causal-style mask (1 where masked), broadcast shape (1, 1, L, L).
    mask = (1.0 - jnp.tril(jnp.ones((L, L), jnp.float32)))[None, None]

    out, attn = multi_head_attention(v_in, k_in, q_in, wq, wk, wv, wc,
                                     n_heads=H, mask=mask)
    jax.block_until_ready((out, attn))

    ref_out, ref_attn = _reference(v_in, k_in, q_in, wq, wk, wv, wc, H, mask=mask)
    # Tolerance reflects bf16 MXU operands (f32 accumulation); softmax normalization
    # itself uses an exact reciprocal, so weight rows sum to 1.
    assert jnp.allclose(out, ref_out, atol=2e-2, rtol=2e-2)
    assert jnp.allclose(attn, ref_attn, atol=2e-2, rtol=2e-2)

    print("KERNEL_OK")
</pallas_src>

<mosaic_0001>
module attributes {stable_mosaic.version = 11 : i64} {
  func.func @kernel(%arg0: i32, %arg1: i32, %arg2: memref<1x8x32xbf16, #tpu.memory_space<vmem>>, %arg3: memref<1x8x32xbf16, #tpu.memory_space<vmem>>, %arg4: memref<1x8x32xbf16, #tpu.memory_space<vmem>>, %arg5: memref<8x8xf32, #tpu.memory_space<vmem>>, %arg6: memref<32x32xbf16, #tpu.memory_space<vmem>>, %arg7: memref<32x32xbf16, #tpu.memory_space<vmem>>, %arg8: memref<32x32xbf16, #tpu.memory_space<vmem>>, %arg9: memref<32x32xbf16, #tpu.memory_space<vmem>>, %arg10: memref<1x8x32xf32, #tpu.memory_space<vmem>>, %arg11: memref<1x4x8x8xf32, #tpu.memory_space<vmem>>, %arg12: memref<8x32xbf16, #tpu.memory_space<vmem>>, %arg13: memref<8x32xbf16, #tpu.memory_space<vmem>>, %arg14: memref<8x32xf32, #tpu.memory_space<vmem>>) attributes {dimension_semantics = [#tpu.dimension_semantics<parallel>, #tpu.dimension_semantics<arbitrary>], iteration_bounds = array<i64: 2, 1>, scalar_prefetch = 0 : i64, scratch_operands = 3 : i64, tpu.core_type = #tpu.core_type<tc>, window_params = [{transform_indices = @transform_0, window_bounds = array<i64: 1, 8, 32>}, {transform_indices = @transform_1, window_bounds = array<i64: 1, 8, 32>}, {transform_indices = @transform_2, window_bounds = array<i64: 1, 8, 32>}, {transform_indices = @transform_3, window_bounds = array<i64: 8, 8>}, {pipeline_mode = #tpu.pipeline_mode<synchronous>, transform_indices = @transform_4, window_bounds = array<i64: 32, 32>}, {pipeline_mode = #tpu.pipeline_mode<synchronous>, transform_indices = @transform_5, window_bounds = array<i64: 32, 32>}, {pipeline_mode = #tpu.pipeline_mode<synchronous>, transform_indices = @transform_6, window_bounds = array<i64: 32, 32>}, {pipeline_mode = #tpu.pipeline_mode<synchronous>, transform_indices = @transform_7, window_bounds = array<i64: 32, 32>}, {transform_indices = @transform_8, window_bounds = array<i64: 1, 8, 32>}, {transform_indices = @transform_9, window_bounds = array<i64: 1, 4, 8, 8>}]} {
    %c0_i32 = arith.constant 0 : i32
    %0 = arith.cmpi eq, %arg1, %c0_i32 : i32
    %1 = arith.extui %0 : i1 to i32
    %c0_i32_0 = arith.constant 0 : i32
    %2 = arith.cmpi ne, %1, %c0_i32_0 : i32
    scf.if %2 {
      %c0_69 = arith.constant 0 : index
      %c0_70 = arith.constant 0 : index
      %c0_71 = arith.constant 0 : index
      %104 = vector.load %arg3[%c0_69, %c0_70, %c0_71] : memref<1x8x32xbf16, #tpu.memory_space<vmem>>, vector<1x8x32xbf16>
      %105 = vector.shape_cast %104 : vector<1x8x32xbf16> to vector<8x32xbf16>
      %c0_72 = arith.constant 0 : index
      %c0_73 = arith.constant 0 : index
      %106 = vector.load %arg7[%c0_72, %c0_73] : memref<32x32xbf16, #tpu.memory_space<vmem>>, vector<32x32xbf16>
      %cst_74 = arith.constant dense<0.000000e+00> : vector<8x32xf32>
      %107 = tpu.matmul %105, %106, %cst_74 {dimension_numbers = #tpu.dot_dimension_numbers<[1], [0], [0], [1], [0, 0, 1, 1], [], []>} : vector<8x32xbf16>, vector<32x32xbf16>, vector<8x32xf32> -> vector<8x32xf32>
      %108 = arith.truncf %107 : vector<8x32xf32> to vector<8x32xbf16>
      %c0_75 = arith.constant 0 : index
      %c0_76 = arith.constant 0 : index
      %109 = vector.load %arg12[%c0_75, %c0_76] : memref<8x32xbf16, #tpu.memory_space<vmem>>, vector<8x32xbf16>
      tpu.vector_store %arg12[%c0_75, %c0_76], %108 {strides = array<i32>} : memref<8x32xbf16, #tpu.memory_space<vmem>>, vector<8x32xbf16>,
      %c0_77 = arith.constant 0 : index
      %c0_78 = arith.constant 0 : index
      %c0_79 = arith.constant 0 : index
      %110 = vector.load %arg4[%c0_77, %c0_78, %c0_79] : memref<1x8x32xbf16, #tpu.memory_space<vmem>>, vector<1x8x32xbf16>
      %111 = vector.shape_cast %110 : vector<1x8x32xbf16> to vector<8x32xbf16>
      %c0_80 = arith.constant 0 : index
      %c0_81 = arith.constant 0 : index
      %112 = vector.load %arg8[%c0_80, %c0_81] : memref<32x32xbf16, #tpu.memory_space<vmem>>, vector<32x32xbf16>
      %cst_82 = arith.constant dense<0.000000e+00> : vector<8x32xf32>
      %113 = tpu.matmul %111, %112, %cst_82 {dimension_numbers = #tpu.dot_dimension_numbers<[1], [0], [0], [1], [0, 0, 1, 1], [], []>} : vector<8x32xbf16>, vector<32x32xbf16>, vector<8x32xf32> -> vector<8x32xf32>
      %114 = arith.truncf %113 : vector<8x32xf32> to vector<8x32xbf16>
      %c0_83 = arith.constant 0 : index
      %c0_84 = arith.constant 0 : index
      %115 = vector.load %arg13[%c0_83, %c0_84] : memref<8x32xbf16, #tpu.memory_space<vmem>>, vector<8x32xbf16>
      tpu.vector_store %arg13[%c0_83, %c0_84], %114 {strides = array<i32>} : memref<8x32xbf16, #tpu.memory_space<vmem>>, vector<8x32xbf16>,
    } else {
    }
    %c0 = arith.constant 0 : index
    %c0_1 = arith.constant 0 : index
    %c0_2 = arith.constant 0 : index
    %3 = vector.load %arg2[%c0, %c0_1, %c0_2] : memref<1x8x32xbf16, #tpu.memory_space<vmem>>, vector<1x8x32xbf16>
    %4 = vector.shape_cast %3 : vector<1x8x32xbf16> to vector<8x32xbf16>
    %c0_3 = arith.constant 0 : index
    %c0_4 = arith.constant 0 : index
    %5 = vector.load %arg6[%c0_3, %c0_4] : memref<32x32xbf16, #tpu.memory_space<vmem>>, vector<32x32xbf16>
    %cst = arith.constant dense<0.000000e+00> : vector<8x32xf32>
    %6 = tpu.matmul %4, %5, %cst {dimension_numbers = #tpu.dot_dimension_numbers<[1], [0], [0], [1], [0, 0, 1, 1], [], []>} : vector<8x32xbf16>, vector<32x32xbf16>, vector<8x32xf32> -> vector<8x32xf32>
    %7 = arith.truncf %6 : vector<8x32xf32> to vector<8x32xbf16>
    %c0_5 = arith.constant 0 : index
    %c0_6 = arith.constant 0 : index
    %8 = vector.load %arg5[%c0_5, %c0_6] : memref<8x8xf32, #tpu.memory_space<vmem>>, vector<8x8xf32>
    %9 = vector.extract_strided_slice %7 {offsets = [0, 0], sizes = [8, 8], strides = [1, 1]} : vector<8x32xbf16> to vector<8x8xbf16>
    %c0_7 = arith.constant 0 : index
    %c0_8 = arith.constant 0 : index
    %10 = vector.load %arg12[%c0_7, %c0_8] : memref<8x32xbf16, #tpu.memory_space<vmem>>, vector<8x8xbf16>
    %c0_9 = arith.constant 0 : index
    %c0_10 = arith.constant 0 : index
    %11 = vector.load %arg13[%c0_9, %c0_10] : memref<8x32xbf16, #tpu.memory_space<vmem>>, vector<8x8xbf16>
    %cst_11 = arith.constant dense<0.000000e+00> : vector<8x8xf32>
    %12 = tpu.matmul %9, %10, %cst_11 {dimension_numbers = #tpu.dot_dimension_numbers<[1], [1], [0], [0], [0, 0, 1, 0], [], []>} : vector<8x8xbf16>, vector<8x8xbf16>, vector<8x8xf32> -> vector<8x8xf32>
    %13 = arith.addf %12, %8 : vector<8x8xf32>
    %cst_12 = arith.constant dense<0xFF800000> : vector<8xf32>
    %14 = vector.multi_reduction <maximumf>, %13, %cst_12 [1] : vector<8x8xf32> to vector<8xf32>
    %15 = vector.shape_cast %14 : vector<8xf32> to vector<8x1xf32>
    %16 = vector.broadcast %15 : vector<8x1xf32> to vector<8x8xf32>
    %17 = arith.subf %13, %16 : vector<8x8xf32>
    %18 = math.exp %17 : vector<8x8xf32>
    %cst_13 = arith.constant dense<0.000000e+00> : vector<8xf32>
    %19 = vector.multi_reduction <add>, %18, %cst_13 [1] : vector<8x8xf32> to vector<8xf32>
    %20 = vector.shape_cast %19 : vector<8xf32> to vector<8x1xf32>
    %cst_14 = arith.constant 1.000000e+00 : f32
    %21 = vector.broadcast %cst_14 : f32 to vector<8x1xf32>
    %22 = arith.divf %21, %20 : vector<8x1xf32>
    %23 = vector.broadcast %22 : vector<8x1xf32> to vector<8x8xf32>
    %24 = arith.mulf %18, %23 : vector<8x8xf32>
    %c0_15 = arith.constant 0 : index
    %c0_16 = arith.constant 0 : index
    %c0_17 = arith.constant 0 : index
    %c0_18 = arith.constant 0 : index
    %25 = vector.load %arg11[%c0_15, %c0_16, %c0_17, %c0_18] : memref<1x4x8x8xf32, #tpu.memory_space<vmem>>, vector<1x1x8x8xf32>
    %26 = vector.shape_cast %25 : vector<1x1x8x8xf32> to vector<8x8xf32>
    %27 = vector.shape_cast %24 : vector<8x8xf32> to vector<1x1x8x8xf32>
    tpu.vector_store %arg11[%c0_15, %c0_16, %c0_17, %c0_18], %27 {strides = array<i32>} : memref<1x4x8x8xf32, #tpu.memory_space<vmem>>, vector<1x1x8x8xf32>,
    %28 = arith.truncf %24 : vector<8x8xf32> to vector<8x8xbf16>
    %cst_19 = arith.constant dense<0.000000e+00> : vector<8x8xf32>
    %29 = tpu.matmul %28, %11, %cst_19 {dimension_numbers = #tpu.dot_dimension_numbers<[1], [0], [0], [1], [0, 0, 1, 1], [], []>} : vector<8x8xbf16>, vector<8x8xbf16>, vector<8x8xf32> -> vector<8x8xf32>
    %c0_20 = arith.constant 0 : index
    %c0_21 = arith.constant 0 : index
    %30 = vector.load %arg14[%c0_20, %c0_21] : memref<8x32xf32, #tpu.memory_space<vmem>>, vector<8x8xf32>
    tpu.vector_store %arg14[%c0_20, %c0_21], %29 {strides = array<i32>} : memref<8x32xf32, #tpu.memory_space<vmem>>, vector<8x8xf32>,
    %31 = vector.extract_strided_slice %7 {offsets = [0, 8], sizes = [8, 8], strides = [1, 1]} : vector<8x32xbf16> to vector<8x8xbf16>
    %c0_22 = arith.constant 0 : index
    %c8 = arith.constant 8 : index
    %32 = vector.load %arg12[%c0_22, %c8] : memref<8x32xbf16, #tpu.memory_space<vmem>>, vector<8x8xbf16>
    %c0_23 = arith.constant 0 : index
    %c8_24 = arith.constant 8 : index
    %33 = vector.load %arg13[%c0_23, %c8_24] : memref<8x32xbf16, #tpu.memory_space<vmem>>, vector<8x8xbf16>
    %cst_25 = arith.constant dense<0.000000e+00> : vector<8x8xf32>
    %34 = tpu.matmul %31, %32, %cst_25 {dimension_numbers = #tpu.dot_dimension_numbers<[1], [1], [0], [0], [0, 0, 1, 0], [], []>} : vector<8x8xbf16>, vector<8x8xbf16>, vector<8x8xf32> -> vector<8x8xf32>
    %35 = arith.addf %34, %8 : vector<8x8xf32>
    %cst_26 = arith.constant dense<0xFF800000> : vector<8xf32>
    %36 = vector.multi_reduction <maximumf>, %35, %cst_26 [1] : vector<8x8xf32> to vector<8xf32>
    %37 = vector.shape_cast %36 : vector<8xf32> to vector<8x1xf32>
    %38 = vector.broadcast %37 : vector<8x1xf32> to vector<8x8xf32>
    %39 = arith.subf %35, %38 : vector<8x8xf32>
    %40 = math.exp %39 : vector<8x8xf32>
    %cst_27 = arith.constant dense<0.000000e+00> : vector<8xf32>
    %41 = vector.multi_reduction <add>, %40, %cst_27 [1] : vector<8x8xf32> to vector<8xf32>
    %42 = vector.shape_cast %41 : vector<8xf32> to vector<8x1xf32>
    %cst_28 = arith.constant 1.000000e+00 : f32
    %43 = vector.broadcast %cst_28 : f32 to vector<8x1xf32>
    %44 = arith.divf %43, %42 : vector<8x1xf32>
    %45 = vector.broadcast %44 : vector<8x1xf32> to vector<8x8xf32>
    %46 = arith.mulf %40, %45 : vector<8x8xf32>
    %c0_29 = arith.constant 0 : index
    %c1 = arith.constant 1 : index
    %c0_30 = arith.constant 0 : index
    %c0_31 = arith.constant 0 : index
    %47 = vector.load %arg11[%c0_29, %c1, %c0_30, %c0_31] : memref<1x4x8x8xf32, #tpu.memory_space<vmem>>, vector<1x1x8x8xf32>
    %48 = vector.shape_cast %47 : vector<1x1x8x8xf32> to vector<8x8xf32>
    %49 = vector.shape_cast %46 : vector<8x8xf32> to vector<1x1x8x8xf32>
    tpu.vector_store %arg11[%c0_29, %c1, %c0_30, %c0_31], %49 {strides = array<i32>} : memref<1x4x8x8xf32, #tpu.memory_space<vmem>>, vector<1x1x8x8xf32>,
    %50 = arith.truncf %46 : vector<8x8xf32> to vector<8x8xbf16>
    %cst_32 = arith.constant dense<0.000000e+00> : vector<8x8xf32>
    %51 = tpu.matmul %50, %33, %cst_32 {dimension_numbers = #tpu.dot_dimension_numbers<[1], [0], [0], [1], [0, 0, 1, 1], [], []>} : vector<8x8xbf16>, vector<8x8xbf16>, vector<8x8xf32> -> vector<8x8xf32>
    %c0_33 = arith.constant 0 : index
    %c8_34 = arith.constant 8 : index
    %52 = vector.load %arg14[%c0_33, %c8_34] : memref<8x32xf32, #tpu.memory_space<vmem>>, vector<8x8xf32>
    tpu.vector_store %arg14[%c0_33, %c8_34], %51 {strides = array<i32>} : memref<8x32xf32, #tpu.memory_space<vmem>>, vector<8x8xf32>,
    %53 = vector.extract_strided_slice %7 {offsets = [0, 16], sizes = [8, 8], strides = [1, 1]} : vector<8x32xbf16> to vector<8x8xbf16>
    %c0_35 = arith.constant 0 : index
    %c16 = arith.constant 16 : index
    %54 = vector.load %arg12[%c0_35, %c16] : memref<8x32xbf16, #tpu.memory_space<vmem>>, vector<8x8xbf16>
    %c0_36 = arith.constant 0 : index
    %c16_37 = arith.constant 16 : index
    %55 = vector.load %arg13[%c0_36, %c16_37] : memref<8x32xbf16, #tpu.memory_space<vmem>>, vector<8x8xbf16>
    %cst_38 = arith.constant dense<0.000000e+00> : vector<8x8xf32>
    %56 = tpu.matmul %53, %54, %cst_38 {dimension_numbers = #tpu.dot_dimension_numbers<[1], [1], [0], [0], [0, 0, 1, 0], [], []>} : vector<8x8xbf16>, vector<8x8xbf16>, vector<8x8xf32> -> vector<8x8xf32>
    %57 = arith.addf %56, %8 : vector<8x8xf32>
    %cst_39 = arith.constant dense<0xFF800000> : vector<8xf32>
    %58 = vector.multi_reduction <maximumf>, %57, %cst_39 [1] : vector<8x8xf32> to vector<8xf32>
    %59 = vector.shape_cast %58 : vector<8xf32> to vector<8x1xf32>
    %60 = vector.broadcast %59 : vector<8x1xf32> to vector<8x8xf32>
    %61 = arith.subf %57, %60 : vector<8x8xf32>
    %62 = math.exp %61 : vector<8x8xf32>
    %cst_40 = arith.constant dense<0.000000e+00> : vector<8xf32>
    %63 = vector.multi_reduction <add>, %62, %cst_40 [1] : vector<8x8xf32> to vector<8xf32>
    %64 = vector.shape_cast %63 : vector<8xf32> to vector<8x1xf32>
    %cst_41 = arith.constant 1.000000e+00 : f32
    %65 = vector.broadcast %cst_41 : f32 to vector<8x1xf32>
    %66 = arith.divf %65, %64 : vector<8x1xf32>
    %67 = vector.broadcast %66 : vector<8x1xf32> to vector<8x8xf32>
    %68 = arith.mulf %62, %67 : vector<8x8xf32>
    %c0_42 = arith.constant 0 : index
    %c2 = arith.constant 2 : index
    %c0_43 = arith.constant 0 : index
    %c0_44 = arith.constant 0 : index
    %69 = vector.load %arg11[%c0_42, %c2, %c0_43, %c0_44] : memref<1x4x8x8xf32, #tpu.memory_space<vmem>>, vector<1x1x8x8xf32>
    %70 = vector.shape_cast %69 : vector<1x1x8x8xf32> to vector<8x8xf32>
    %71 = vector.shape_cast %68 : vector<8x8xf32> to vector<1x1x8x8xf32>
    tpu.vector_store %arg11[%c0_42, %c2, %c0_43, %c0_44], %71 {strides = array<i32>} : memref<1x4x8x8xf32, #tpu.memory_space<vmem>>, vector<1x1x8x8xf32>,
    %72 = arith.truncf %68 : vector<8x8xf32> to vector<8x8xbf16>
    %cst_45 = arith.constant dense<0.000000e+00> : vector<8x8xf32>
    %73 = tpu.matmul %72, %55, %cst_45 {dimension_numbers = #tpu.dot_dimension_numbers<[1], [0], [0], [1], [0, 0, 1, 1], [], []>} : vector<8x8xbf16>, vector<8x8xbf16>, vector<8x8xf32> -> vector<8x8xf32>
    %c0_46 = arith.constant 0 : index
    %c16_47 = arith.constant 16 : index
    %74 = vector.load %arg14[%c0_46, %c16_47] : memref<8x32xf32, #tpu.memory_space<vmem>>, vector<8x8xf32>
    tpu.vector_store %arg14[%c0_46, %c16_47], %73 {strides = array<i32>} : memref<8x32xf32, #tpu.memory_space<vmem>>, vector<8x8xf32>,
    %75 = vector.extract_strided_slice %7 {offsets = [0, 24], sizes = [8, 8], strides = [1, 1]} : vector<8x32xbf16> to vector<8x8xbf16>
    %c0_48 = arith.constant 0 : index
    %c24 = arith.constant 24 : index
    %76 = vector.load %arg12[%c0_48, %c24] : memref<8x32xbf16, #tpu.memory_space<vmem>>, vector<8x8xbf16>
    %c0_49 = arith.constant 0 : index
    %c24_50 = arith.constant 24 : index
    %77 = vector.load %arg13[%c0_49, %c24_50] : memref<8x32xbf16, #tpu.memory_space<vmem>>, vector<8x8xbf16>
    %cst_51 = arith.constant dense<0.000000e+00> : vector<8x8xf32>
    %78 = tpu.matmul %75, %76, %cst_51 {dimension_numbers = #tpu.dot_dimension_numbers<[1], [1], [0], [0], [0, 0, 1, 0], [], []>} : vector<8x8xbf16>, vector<8x8xbf16>, vector<8x8xf32> -> vector<8x8xf32>
    %79 = arith.addf %78, %8 : vector<8x8xf32>
    %cst_52 = arith.constant dense<0xFF800000> : vector<8xf32>
    %80 = vector.multi_reduction <maximumf>, %79, %cst_52 [1] : vector<8x8xf32> to vector<8xf32>
    %81 = vector.shape_cast %80 : vector<8xf32> to vector<8x1xf32>
    %82 = vector.broadcast %81 : vector<8x1xf32> to vector<8x8xf32>
    %83 = arith.subf %79, %82 : vector<8x8xf32>
    %84 = math.exp %83 : vector<8x8xf32>
    %cst_53 = arith.constant dense<0.000000e+00> : vector<8xf32>
    %85 = vector.multi_reduction <add>, %84, %cst_53 [1] : vector<8x8xf32> to vector<8xf32>
    %86 = vector.shape_cast %85 : vector<8xf32> to vector<8x1xf32>
    %cst_54 = arith.constant 1.000000e+00 : f32
    %87 = vector.broadcast %cst_54 : f32 to vector<8x1xf32>
    %88 = arith.divf %87, %86 : vector<8x1xf32>
    %89 = vector.broadcast %88 : vector<8x1xf32> to vector<8x8xf32>
    %90 = arith.mulf %84, %89 : vector<8x8xf32>
    %c0_55 = arith.constant 0 : index
    %c3 = arith.constant 3 : index
    %c0_56 = arith.constant 0 : index
    %c0_57 = arith.constant 0 : index
    %91 = vector.load %arg11[%c0_55, %c3, %c0_56, %c0_57] : memref<1x4x8x8xf32, #tpu.memory_space<vmem>>, vector<1x1x8x8xf32>
    %92 = vector.shape_cast %91 : vector<1x1x8x8xf32> to vector<8x8xf32>
    %93 = vector.shape_cast %90 : vector<8x8xf32> to vector<1x1x8x8xf32>
    tpu.vector_store %arg11[%c0_55, %c3, %c0_56, %c0_57], %93 {strides = array<i32>} : memref<1x4x8x8xf32, #tpu.memory_space<vmem>>, vector<1x1x8x8xf32>,
    %94 = arith.truncf %90 : vector<8x8xf32> to vector<8x8xbf16>
    %cst_58 = arith.constant dense<0.000000e+00> : vector<8x8xf32>
    %95 = tpu.matmul %94, %77, %cst_58 {dimension_numbers = #tpu.dot_dimension_numbers<[1], [0], [0], [1], [0, 0, 1, 1], [], []>} : vector<8x8xbf16>, vector<8x8xbf16>, vector<8x8xf32> -> vector<8x8xf32>
    %c0_59 = arith.constant 0 : index
    %c24_60 = arith.constant 24 : index
    %96 = vector.load %arg14[%c0_59, %c24_60] : memref<8x32xf32, #tpu.memory_space<vmem>>, vector<8x8xf32>
    tpu.vector_store %arg14[%c0_59, %c24_60], %95 {strides = array<i32>} : memref<8x32xf32, #tpu.memory_space<vmem>>, vector<8x8xf32>,
    %c0_61 = arith.constant 0 : index
    %c0_62 = arith.constant 0 : index
    %97 = vector.load %arg14[%c0_61, %c0_62] : memref<8x32xf32, #tpu.memory_space<vmem>>, vector<8x32xf32>
    %98 = arith.truncf %97 : vector<8x32xf32> to vector<8x32xbf16>
    %c0_63 = arith.constant 0 : index
    %c0_64 = arith.constant 0 : index
    %99 = vector.load %arg9[%c0_63, %c0_64] : memref<32x32xbf16, #tpu.memory_space<vmem>>, vector<32x32xbf16>
    %cst_65 = arith.constant dense<0.000000e+00> : vector<8x32xf32>
    %100 = tpu.matmul %98, %99, %cst_65 {dimension_numbers = #tpu.dot_dimension_numbers<[1], [0], [0], [1], [0, 0, 1, 1], [], []>} : vector<8x32xbf16>, vector<32x32xbf16>, vector<8x32xf32> -> vector<8x32xf32>
    %c0_66 = arith.constant 0 : index
    %c0_67 = arith.constant 0 : index
    %c0_68 = arith.constant 0 : index
    %101 = vector.load %arg10[%c0_66, %c0_67, %c0_68] : memref<1x8x32xf32, #tpu.memory_space<vmem>>, vector<1x8x32xf32>
    %102 = vector.shape_cast %101 : vector<1x8x32xf32> to vector<8x32xf32>
    %103 = vector.shape_cast %100 : vector<8x32xf32> to vector<1x8x32xf32>
    tpu.vector_store %arg10[%c0_66, %c0_67, %c0_68], %103 {strides = array<i32>} : memref<1x8x32xf32, #tpu.memory_space<vmem>>, vector<1x8x32xf32>,
    return
  }
  func.func @transform_0(%arg0: i32, %arg1: i32) -> (i32, i32, i32) {
    %c0_i32 = arith.constant 0 : i32
    %c0_i32_0 = arith.constant 0 : i32
    return %arg0, %arg1, %c0_i32 : i32, i32, i32
  }
  func.func @transform_1(%arg0: i32, %arg1: i32) -> (i32, i32, i32) {
    %c0_i32 = arith.constant 0 : i32
    %c0_i32_0 = arith.constant 0 : i32
    %c0_i32_1 = arith.constant 0 : i32
    return %arg0, %c0_i32, %c0_i32_0 : i32, i32, i32
  }
  func.func @transform_2(%arg0: i32, %arg1: i32) -> (i32, i32, i32) {
    %c0_i32 = arith.constant 0 : i32
    %c0_i32_0 = arith.constant 0 : i32
    %c0_i32_1 = arith.constant 0 : i32
    return %arg0, %c0_i32, %c0_i32_0 : i32, i32, i32
  }
  func.func @transform_3(%arg0: i32, %arg1: i32) -> (i32, i32) {
    %c0_i32 = arith.constant 0 : i32
    %c0_i32_0 = arith.constant 0 : i32
    return %arg1, %c0_i32 : i32, i32
  }
  func.func @transform_4(%arg0: i32, %arg1: i32) -> (i32, i32) {
    %c0_i32 = arith.constant 0 : i32
    %c0_i32_0 = arith.constant 0 : i32
    %c0_i32_1 = arith.constant 0 : i32
    return %c0_i32, %c0_i32_0 : i32, i32
  }
  func.func @transform_5(%arg0: i32, %arg1: i32) -> (i32, i32) {
    %c0_i32 = arith.constant 0 : i32
    %c0_i32_0 = arith.constant 0 : i32
    %c0_i32_1 = arith.constant 0 : i32
    return %c0_i32, %c0_i32_0 : i32, i32
  }
  func.func @transform_6(%arg0: i32, %arg1: i32) -> (i32, i32) {
    %c0_i32 = arith.constant 0 : i32
    %c0_i32_0 = arith.constant 0 : i32
    %c0_i32_1 = arith.constant 0 : i32
    return %c0_i32, %c0_i32_0 : i32, i32
  }
  func.func @transform_7(%arg0: i32, %arg1: i32) -> (i32, i32) {
    %c0_i32 = arith.constant 0 : i32
    %c0_i32_0 = arith.constant 0 : i32
    %c0_i32_1 = arith.constant 0 : i32
    return %c0_i32, %c0_i32_0 : i32, i32
  }
  func.func @transform_8(%arg0: i32, %arg1: i32) -> (i32, i32, i32) {
    %c0_i32 = arith.constant 0 : i32
    %c0_i32_0 = arith.constant 0 : i32
    return %arg0, %arg1, %c0_i32 : i32, i32, i32
  }
  func.func @transform_9(%arg0: i32, %arg1: i32) -> (i32, i32, i32, i32) {
    %c0_i32 = arith.constant 0 : i32
    %c0_i32_0 = arith.constant 0 : i32
    %c0_i32_1 = arith.constant 0 : i32
    return %arg0, %c0_i32, %arg1, %c0_i32_0 : i32, i32, i32, i32
  }
}

</mosaic_0001>

<bundles_post_ra>
// kernel: tpu_custom_call.1
= control target key start
LH: loop header
LB: loop body
LE: loop exit
PB: predicated region body
PF: predicated region fallthrough
CT: control target
= control target key end

     0   :  { %s2815_s0 = inlined_call_operand.hbm [shape: bf16[2,8,32], index: 0, kind: input, shape index: {}]   ;;  %s2816_s1 = inlined_call_operand.hbm [shape: bf16[2,8,32], index: 1, kind: input, shape index: {}]   ;;  %s2817_s2 = inlined_call_operand.hbm [shape: bf16[2,8,32], index: 2, kind: input, shape index: {}]   ;;  %s2818_s3 = inlined_call_operand.hbm [shape: f32[8,8], index: 3, kind: input, shape index: {}]   ;;  %s2819_s4 = inlined_call_operand.hbm [shape: bf16[32,32], index: 4, kind: input, shape index: {}]   ;;  %s2820_s5 = inlined_call_operand.hbm [shape: bf16[32,32], index: 5, kind: input, shape index: {}]   ;;  %s2821_s6 = inlined_call_operand.hbm [shape: bf16[32,32], index: 6, kind: input, shape index: {}]   ;;  %s2822_s7 = inlined_call_operand.hbm [shape: bf16[32,32], index: 7, kind: input, shape index: {}]   ;;  %s2823_s8 = inlined_call_operand.hbm [shape: f32[2,8,32], index: 8, kind: output, shape index: {0}]   ;;  %s2824_s9 = inlined_call_operand.hbm [shape: f32[2,4,8,8], index: 9, kind: output, shape index: {1}]  }
   0x1   :  { %2852 = sst [smem:[#allocation36_spill]] %s2816_s1 }
   0x2   :  { %2853 = sst [smem:[#allocation37_spill]] %s2818_s3 }
   0x3   :  { %2854 = sst [smem:[#allocation38_spill]] %s2819_s4 }
   0x4   :  { %2855 = sst [smem:[#allocation39_spill]] %s2820_s5 }
   0x5   :  { %2856 = sst [smem:[#allocation40_spill]] %s2823_s8 }
   0x6   :  { %2857 = sst [smem:[#allocation41_spill]] %s2824_s9 }
   0x7   :  { %15 = vsyncpa [#allocation6], 0 }
   0x8   :  { %17 = vsyncpa [#allocation6 + $0x1], 0 }
   0x9   :  { %18 = vsyncpa [#allocation9], 0 }
   0xa   :  { %20 = vsyncpa [#allocation9 + $0x1], 0 }
   0xb   :  { %21 = vsyncpa [#allocation12], 0 }
   0xc   :  { %22 = vsyncpa [#allocation15], 0 }
   0xd   :  { %23 = vsyncpa [#allocation18], 0 }
   0xe   :  { %24 = vsyncpa [#allocation7], 0 }
   0xf   :  { %26 = vsyncpa [#allocation7 + $0x1], 0 }
  0x10   :  { %27 = vsyncpa [#allocation21], 0 }
  0x11   :  { %29 = vsyncpa [#allocation21 + $0x1], 0  ;;  %s2293_s30 = smov 0   ;;  %s2295_s10 = smov 0  }
  0x12   :  { %s2297_s11 = smov 0   ;;  %s2299_s12 = smov 0  }
  0x13   :  { %s2301_s13 = smov 0   ;;  %s2303_s14 = smov 0  }
  0x14 LB: > { %2858 = sst [smem:[#allocation29_spill]] %s2200_s30  ;;  %s2324_s15 = sadd.s32 4294967295, %s2220_s14   ;;  %s2220_s14 = sphi %s2303_s14, %s35_s14   ;;  %s2216_s13 = sphi %s2301_s13, %s2906_s13   ;;  %s2212_s12 = sphi %s2299_s12, %s2905_s12   ;;  %s2208_s11 = sphi %s2297_s11, %s2909_s11   ;;  %s2204_s10 = sphi %s2295_s10, %s2908_s10   ;;  %s2200_s30 = sphi %s2293_s30, %s2907_s30  }
  0x15   : > { %2859 = sst [smem:[#allocation30_spill]] %s2216_s13  ;;  %p1522_p0 = scmp.ge.s32.totalorder %s2220_s14, 1 }
  0x16   : > { %2860 = sst [smem:[#allocation31_spill]] %s2220_s14  ;;  %p2825_p1 = scmp.eq.s32.totalorder %s2324_s15, 0 }
  0x17   : > { %p298_p2 = scmp.lt.s32.totalorder %s2220_s14, 3  ;;  %s2222_s17 = smov [#allocation11]  }
  0x18   : > { %s313_s18 = sshll.u32 %s2222_s17, 4  ;;  %s2223_s20 = smov [#allocation14]   ;;  %s314_s18 = int_to_ptr.vmem [resolvable:$true] %s313_s18 }
  0x19   : > { %p2329_p3 = pnand %p1522_p0, %p298_p2  ;;  %s336_s21 = sshll.u32 %s2223_s20, 4  ;;  %s2342_s21 = int_to_ptr.vmem [resolvable:$true] %s336_s21 }
  0x1a   : > { %s2863_s3 = sld [smem:[#allocation37_spill]] }
  0x1b   : > { %s2861_s16 = scalar_select %p2329_p3, 1, 0 }
  0x1c   : > { %p1721_p5 = pneg %p2329_p3 }
  0x1e   : > { %p2338_p6 = pnand %p1721_p5, %p2825_p1 }
  0x20   : > { %s2862_s19 = scalar_select %p2338_p6, 1, 0 }
  0x21   : > { %s1860_s24 = scalar_lea.hbm %s2863_s3, 128  ;;  %p2352_p8 = pneg %p2338_p6 }
  0x22   : > { %p1861_p7 = scmp.ne.s32.totalorder %s2863_s3, %s1860_s24  ;;  %p1867_p11 = scmp.lt.u32.totalorder %s1860_s24, %s2863_s3 }
  0x23   : > { %s2864_s27 = scalar_select %p2352_p8, 1, 0 }
  0x24   : > { %p1863_p9 = pnand %p2352_p8, %p1861_p7 }
  0x26   : > { %p1864_p10 = pneg %p1863_p9 }
  0x28   : > { %p1869_p12 = pnand %p1867_p11, %p1864_p10 }
  0x2a   : > { %1872 = shalt.err (!%p1869_p12)
}
  0x2b   : > { %s1873_s17 = scalar_lea.vmem %s314_s18, 128  ;;  %p1881_p5 = scmp.lt.s32.totalorder %s314_s18, %s314_s18 }
  0x2c   : > { %p1874_p13 = scmp.ne.s32.totalorder %s314_s18, %s1873_s17  ;;  %p1882_p4 = scmp.lt.s32.totalorder %s1873_s17, %s1873_s17 }
  0x2e   : > { %p1876_p0 = pnand %p1874_p13, %p2352_p8  ;;  %p1883_p1 = por %p1882_p4, %p1881_p5 }
  0x30   : > { %p1877_p2 = pneg %p1876_p0 }
  0x32   : > { %p1884_p3 = pnand %p1883_p1, %p1877_p2 }
  0x34   : > { %1887 = shalt.err (!%p1884_p3)
}
  0x35   : > { %1724 = dma.hbm_to_vmem [thread:$0]  (!%p2338_p6), %s2863_s3, 128, %s314_s18, [#allocation12]  }
  0x36   : > { %s2865_s5 = sld [smem:[#allocation39_spill]] }
  0x3c   : > { %s1888_s25 = scalar_lea.hbm %s2865_s5, 256 }
  0x3d   : > { %p1889_p7 = scmp.ne.s32.totalorder %s2865_s5, %s1888_s25  ;;  %p1895_p1 = scmp.lt.u32.totalorder %s1888_s25, %s2865_s5 }
  0x3f   : > { %p1891_p9 = pnand %p1889_p7, %p2352_p8 }
  0x41   : > { %p1892_p4 = pneg %p1891_p9 }
  0x43   : > { %p1897_p3 = pnand %p1895_p1, %p1892_p4 }
  0x45   : > { %1900 = shalt.err (!%p1897_p3)
}
  0x46   : > { %s1901_s18 = scalar_lea.vmem %s2342_s21, 256  ;;  %p1909_p13 = scmp.lt.s32.totalorder %s2342_s21, %s2342_s21 }
  0x47   : > { %p1902_p10 = scmp.ne.s32.totalorder %s2342_s21, %s1901_s18  ;;  %p1910_p0 = scmp.lt.s32.totalorder %s1901_s18, %s1901_s18 }
  0x49   : > { %p1904_p11 = pnand %p1902_p10, %p2352_p8  ;;  %p1911_p2 = por %p1910_p0, %p1909_p13 }
  0x4b   : > { %p1905_p12 = pneg %p1904_p11 }
  0x4d   : > { %p1912_p5 = pnand %p1911_p2, %p1905_p12 }
  0x4f   : > { %1915 = shalt.err (!%p1912_p5)
}
  0x50   : > { %s2827_s20 = smov 64   ;;  %s2829_s22 = smov 4  }
  0x51   : > { %1730 = dma.hbm_to_vmem [thread:$0]  (!%p2338_p6), %s2865_s5, 256, %s2342_s21, [#allocation15], %s2827_s20, %s2827_s20, %s2829_s22  }
  0x52   : > { %s1521_s25 = sadd.s32 4294967294, %s2220_s14   ;;  %s47_s26 = sadd.s32 1, %s2216_s13 }
  0x53   : > { %p49_p7 = scmp.ge.s32.totalorder %s47_s26, 2  ;;  %s56_s28 = sadd.s32 1, %s2208_s11 }
  0x54   : > { %p63_p9 = scmp.ne.s32.totalorder %s2208_s11, %s2204_s10  ;;  %p64_p4 = scmp.eq.s32.totalorder %s2220_s14, 0 }
  0x55   : > { %s2911_s26 = smov (%p49_p7, %s47_s26), 0  ;;  %p69_p3 = scmp.ne.s32.totalorder %s2204_s10, %s2200_s30 }
  0x56   : > { %2866 = sst [smem:[#allocation32_spill]] %s2911_s26  ;;  %p2402_p1 = por %p64_p4, %p63_p9 }
  0x57   : > { %s51_s21 = ssub.s32 %s2216_s13, %s2911_s26  ;;  %p257_p10 = scmp.eq.s32.totalorder %s2324_s15, 1 }
  0x58   : > { %p54_p11 = scmp.eq.s32.totalorder %s51_s21, 0  ;;  %p2868_p12 = scmp.eq.s32.totalorder %s2324_s15, 0 }
  0x59   : > { %p2417_p0 = por %p257_p10, %p63_p9  ;;  %p263_p2 = scmp.eq.s32.totalorder %s1521_s25, 1 }
  0x5a   : > { %p2413_p13 = por %p2868_p12, %p69_p3  ;;  %p1759_p7 = scmp.lt.s32.totalorder %s2220_s14, 2 }
  0x5b   : > { %s2870_s18 = scalar_select %p2417_p0, 1, 0 }
  0x5c   : > { %s2869_s17 = scalar_select %p2413_p13, 1, 0 }
  0x5d   : > { %2871 = sst [smem:[#allocation33_spill]] %s2870_s18  ;;  %p2424_p5 = por %p263_p2, %p69_p3 }
  0x5e   : > { %s2422_s23 = scalar_select %p54_p11, %s2208_s11, %s56_s28  }
  0x5f   : > { %s2873_s24 = scalar_select %p2424_p5, 1, 0 }
  0x60   : > { %2872 = sst [smem:[#allocation34_spill]] %s2422_s23  ;;  %s2833_s20 = sand.u32 1, %s2208_s11  }
  0x61   : > { %2874 = sst [smem:[#allocation35_spill]] %s2873_s24  ;;  %s2431_s22 = sshll.u32 %s2216_s13, 6 }
  0x62   : > { %s2435_s21 = sshll.u32 %s2833_s20, 2  ;;  %p2439_p9 = pnand %p1759_p7, %p2402_p1 }
  0x63   : > { %s395_s25 = sand.u32 1, %s2220_s14   ;;  %s2876_s1 = sld [smem:[#allocation36_spill]] }
  0x64   : > { %s2875_s3 = scalar_select %p2439_p9, 1, 0 }
  0x65   : > { %s399_s13 = scalar_lea.vmem [#allocation8], %s2435_s21  ;;  %s2453_s29 = scalar_lea.sflag [#allocation9], %s395_s25 }
  0x66   : > { %s406_s20 = sshll.u32 %s399_s13, 4  ;;  %p2459_p1 = pneg %p2439_p9  ;;  %s2451_s20 = int_to_ptr.vmem [resolvable:$true] %s406_s20 }
  0x68   : > { %s2877_s14 = scalar_select %p2459_p1, 1, 0 }
  0x69   : > { %s2448_s26 = scalar_lea.hbm %s2876_s1, %s2431_s22  ;;  %s1921_s24 = scalar_lea.hbm %s2876_s1, 128 }
  0x6a   : > { %s1916_s23 = scalar_lea.hbm %s2448_s26, 64  ;;  %p1922_p11 = scmp.lt.u32.totalorder %s2448_s26, %s2876_s1 }
  0x6b   : > { %p1917_p4 = scmp.ne.s32.totalorder %s2448_s26, %s1916_s23  ;;  %p1923_p12 = scmp.lt.u32.totalorder %s1921_s24, %s1916_s23 }
  0x6c   : > { %p1925_p7 = scmp.lt.u32.totalorder %s1916_s23, %s2448_s26 }
  0x6d   : > { %p1919_p3 = pnand %p2459_p1, %p1917_p4  ;;  %p1924_p2 = por %p1923_p12, %p1922_p11 }
  0x6f   : > { %p1920_p10 = pneg %p1919_p3  ;;  %p1926_p5 = por %p1925_p7, %p1924_p2 }
  0x71   : > { %p1927_p0 = pnand %p1926_p5, %p1920_p10 }
  0x73   : > { %1930 = shalt.err (!%p1927_p0)
}
  0x74   : > { %s1931_s25 = scalar_lea.vmem %s2451_s20, 64  ;;  %s2226_s5 = smov [#allocation8]  }
  0x75   : > { %p1932_p4 = scmp.ne.s32.totalorder %s2451_s20, %s1931_s25  ;;  %s1936_s28 = sshll.u32 %s2226_s5, 4  ;;  %s1937_s28 = int_to_ptr.vmem [resolvable:$false] %s1936_s28 }
  0x76   : > { %s1938_s30 = scalar_lea.vmem %s1937_s28, 128  ;;  %p1939_p6 = scmp.lt.s32.totalorder %s2451_s20, %s1937_s28 }
  0x77   : > { %p1934_p3 = pnand %p1932_p4, %p2459_p1  ;;  %p1940_p8 = scmp.lt.s32.totalorder %s1938_s30, %s1931_s25 }
  0x79   : > { %p1935_p13 = pneg %p1934_p3  ;;  %p1941_p11 = por %p1940_p8, %p1939_p6 }
  0x7b   : > { %p1942_p12 = pnand %p1941_p11, %p1935_p13 }
  0x7d   : > { %1945 = shalt.err (!%p1942_p12)
}
  0x7e   : > { %1743 = dma.hbm_to_vmem [thread:$0]  (!%p2439_p9), %s2448_s26, 64, %s2451_s20, %s2453_s29  }
  0x7f   : > { %s2227_s23 = smov [#allocation13]   ;;  %s2228_s13 = smov [#allocation16]  }
  0x80   : > { %s323_s24 = sshll.u32 %s2227_s23, 4  ;;  %s349_s1 = sshll.u32 %s2228_s13, 4  ;;  %s324_s24 = int_to_ptr.vmem [resolvable:$true] %s323_s24  ;;  %s350_s1 = int_to_ptr.vmem [resolvable:$true] %s349_s1 }
  0x81   : > { %s2878_s4 = sld [smem:[#allocation38_spill]]  ;;  %p2879_p8 = scmp.ne.s32.totalorder %s2864_s27, 0 }
  0x87   : > { %s1946_s28 = scalar_lea.hbm %s2878_s4, 256 }
  0x88   : > { %p1947_p6 = scmp.ne.s32.totalorder %s2878_s4, %s1946_s28  ;;  %p1953_p5 = scmp.lt.u32.totalorder %s1946_s28, %s2878_s4 }
  0x8a   : > { %p1949_p13 = pnand %p1947_p6, %p2879_p8 }
  0x8c   : > { %p1950_p0 = pneg %p1949_p13 }
  0x8e   : > { %p1955_p10 = pnand %p1953_p5, %p1950_p0 }
  0x90   : > { %1958 = shalt.err (!%p1955_p10)
}
  0x91   : > { %s1959_s20 = scalar_lea.vmem %s324_s24, 256  ;;  %p1967_p3 = scmp.lt.s32.totalorder %s324_s24, %s324_s24 }
  0x92   : > { %p1960_p2 = scmp.ne.s32.totalorder %s324_s24, %s1959_s20  ;;  %p1968_p11 = scmp.lt.s32.totalorder %s1959_s20, %s1959_s20 }
  0x94   : > { %p1962_p7 = pnand %p1960_p2, %p2879_p8  ;;  %p1969_p12 = por %p1968_p11, %p1967_p3 }
  0x96   : > { %p1963_p4 = pneg %p1962_p7 }
  0x98   : > { %p1970_p9 = pnand %p1969_p12, %p1963_p4 }
  0x9a   : > { %1973 = shalt.err (!%p1970_p9)
}
  0x9b   : > { %p2880_p6 = scmp.ne.s32.totalorder %s2862_s19, 0  ;;  %s2881_s8 = smov 4  }
  0x9c   : > { %s2882_s26 = smov 64   ;;  %s1974_s5 = scalar_lea.hbm %s2821_s6, 256 }
  0x9d   : > { %1727 = dma.hbm_to_vmem [thread:$0]  (!%p2880_p6), %s2878_s4, 256, %s324_s24, [#allocation12], %s2882_s26, %s2882_s26, %s2881_s8  }
  0x9e   : > { %p1975_p13 = scmp.ne.s32.totalorder %s2821_s6, %s1974_s5  ;;  %p1981_p5 = scmp.lt.u32.totalorder %s1974_s5, %s2821_s6 }
  0xa0   : > { %p1977_p9 = pnand %p1975_p13, %p2879_p8 }
  0xa2   : > { %p1978_p0 = pneg %p1977_p9 }
  0xa4   : > { %p1983_p10 = pnand %p1981_p5, %p1978_p0 }
  0xa6   : > { %1986 = shalt.err (!%p1983_p10)
}
  0xa7   : > { %s1987_s9 = scalar_lea.vmem %s350_s1, 256  ;;  %p1995_p3 = scmp.lt.s32.totalorder %s350_s1, %s350_s1 }
  0xa8   : > { %p1988_p2 = scmp.ne.s32.totalorder %s350_s1, %s1987_s9  ;;  %p1996_p11 = scmp.lt.s32.totalorder %s1987_s9, %s1987_s9 }
  0xaa   : > { %p1990_p7 = pnand %p1988_p2, %p2879_p8  ;;  %p1997_p12 = por %p1996_p11, %p1995_p3 }
  0xac   : > { %p1991_p4 = pneg %p1990_p7 }
  0xae   : > { %p1998_p1 = pnand %p1997_p12, %p1991_p4 }
  0xb0   : > { %2001 = shalt.err (!%p1998_p1)
}
  0xb1   : > { %1733 = dma.hbm_to_vmem [thread:$0]  (!%p2880_p6), %s2821_s6, 256, %s350_s1, [#allocation15], %s2882_s26, %s2882_s26, %s2881_s8  }
  0xb2   : > { %s2229_s23 = smov [#allocation17]   ;;  %s2002_s25 = scalar_lea.hbm %s2822_s7, 256 }
  0xb3   : > { %s362_s13 = sshll.u32 %s2229_s23, 4  ;;  %p2003_p1 = scmp.ne.s32.totalorder %s2822_s7, %s2002_s25  ;;  %s363_s13 = int_to_ptr.vmem [resolvable:$true] %s362_s13 }
  0xb4   : > { %p2009_p0 = scmp.lt.u32.totalorder %s2002_s25, %s2822_s7 }
  0xb5   : > { %p2005_p13 = pnand %p2003_p1, %p2879_p8 }
  0xb7   : > { %p2006_p9 = pneg %p2005_p13 }
  0xb9   : > { %p2011_p5 = pnand %p2009_p0, %p2006_p9 }
  0xbb   : > { %2014 = shalt.err (!%p2011_p5)
}
  0xbc   : > { %s2015_s1 = scalar_lea.vmem %s363_s13, 256  ;;  %p2023_p4 = scmp.lt.s32.totalorder %s363_s13, %s363_s13 }
  0xbd   : > { %p2016_p10 = scmp.ne.s32.totalorder %s363_s13, %s2015_s1  ;;  %p2024_p3 = scmp.lt.s32.totalorder %s2015_s1, %s2015_s1 }
  0xbf   : > { %p2018_p2 = pnand %p2016_p10, %p2879_p8  ;;  %p2025_p11 = por %p2024_p3, %p2023_p4 }
  0xc1   : > { %p2019_p7 = pneg %p2018_p2 }
  0xc3   : > { %p2026_p12 = pnand %p2025_p11, %p2019_p7 }
  0xc5   : > { %2029 = shalt.err (!%p2026_p12)
}
  0xc6   : > { %1736 = dma.hbm_to_vmem [thread:$0]  (!%p2880_p6), %s2822_s7, 256, %s363_s13, [#allocation18], %s2882_s26, %s2882_s26, %s2881_s8  }
  0xc7   : > { %s2550_s23 = scalar_lea.hbm %s2815_s0, %s2431_s22  ;;  %s380_s19 = scalar_lea.vmem [#allocation5], %s2435_s21 }
  0xc8   : > { %s388_s5 = sshll.u32 %s380_s19, 4  ;;  %s2883_s28 = sand.u32 1, %s2208_s11   ;;  %s389_s5 = int_to_ptr.vmem [resolvable:$true] %s388_s5 }
  0xc9   : > { %s377_s25 = scalar_lea.sflag [#allocation6], %s2883_s28  ;;  %s2030_s30 = scalar_lea.hbm %s2550_s23, 64 }
  0xca   : > { %p2031_p8 = scmp.ne.s32.totalorder %s2550_s23, %s2030_s30  ;;  %p2884_p1 = scmp.ne.s32.totalorder %s2877_s14, 0 }
  0xcb   : > { %s2035_s13 = scalar_lea.hbm %s2815_s0, 128  ;;  %p2036_p6 = scmp.lt.u32.totalorder %s2550_s23, %s2815_s0 }
  0xcc   : > { %p2033_p13 = pnand %p2031_p8, %p2884_p1  ;;  %p2037_p0 = scmp.lt.u32.totalorder %s2035_s13, %s2030_s30 }
  0xcd   : > { %p2039_p10 = scmp.lt.u32.totalorder %s2030_s30, %s2550_s23 }
  0xce   : > { %p2034_p9 = pneg %p2033_p13  ;;  %p2038_p5 = por %p2037_p0, %p2036_p6 }
  0xd0   : > { %p2040_p2 = por %p2039_p10, %p2038_p5 }
  0xd2   : > { %p2041_p7 = pnand %p2040_p2, %p2034_p9 }
  0xd4   : > { %2044 = shalt.err (!%p2041_p7)
}
  0xd5   : > { %s2045_s1 = scalar_lea.vmem %s389_s5, 64  ;;  %s2230_s4 = smov [#allocation5]  }
  0xd6   : > { %p2046_p4 = scmp.ne.s32.totalorder %s389_s5, %s2045_s1  ;;  %s2050_s24 = sshll.u32 %s2230_s4, 4  ;;  %s2051_s24 = int_to_ptr.vmem [resolvable:$false] %s2050_s24 }
  0xd7   : > { %s2052_s27 = scalar_lea.vmem %s2051_s24, 128  ;;  %p2053_p12 = scmp.lt.s32.totalorder %s389_s5, %s2051_s24 }
  0xd8   : > { %p2048_p3 = pnand %p2046_p4, %p2884_p1  ;;  %p2054_p8 = scmp.lt.s32.totalorder %s2052_s27, %s2045_s1 }
  0xda   : > { %p2049_p11 = pneg %p2048_p3  ;;  %p2055_p13 = por %p2054_p8, %p2053_p12 }
  0xdc   : > { %p2056_p0 = pnand %p2055_p13, %p2049_p11 }
  0xde   : > { %2059 = shalt.err (!%p2056_p0)
}
  0xdf   : > { %p2885_p6 = scmp.ne.s32.totalorder %s2875_s3, 0  ;;  %s2576_s28 = scalar_lea.hbm %s2817_s2, %s2431_s22 }
  0xe0   : > { %s417_s30 = scalar_lea.vmem [#allocation10], %s2435_s21  ;;  %s2060_s26 = scalar_lea.hbm %s2576_s28, 64 }
  0xe1   : > { %1740 = dma.hbm_to_vmem [thread:$0]  (!%p2885_p6), %s2550_s23, 64, %s389_s5, %s377_s25  }
  0xe2   : > { %s424_s8 = sshll.u32 %s417_s30, 4  ;;  %p2061_p9 = scmp.ne.s32.totalorder %s2576_s28, %s2060_s26  ;;  %s425_s8 = int_to_ptr.vmem [resolvable:$true] %s424_s8 }
  0xe3   : > { %s2065_s23 = scalar_lea.hbm %s2817_s2, 128  ;;  %p2066_p2 = scmp.lt.u32.totalorder %s2576_s28, %s2817_s2 }
  0xe4   : > { %p2063_p5 = pnand %p2061_p9, %p2884_p1  ;;  %p2067_p7 = scmp.lt.u32.totalorder %s2065_s23, %s2060_s26 }
  0xe5   : > { %p2069_p3 = scmp.lt.u32.totalorder %s2060_s26, %s2576_s28 }
  0xe6   : > { %p2064_p10 = pneg %p2063_p5  ;;  %p2068_p4 = por %p2067_p7, %p2066_p2 }
  0xe8   : > { %p2070_p11 = por %p2069_p3, %p2068_p4 }
  0xea   : > { %p2071_p12 = pnand %p2070_p11, %p2064_p10 }
  0xec   : > { %2074 = shalt.err (!%p2071_p12)
}
  0xed   : > { %s2075_s22 = scalar_lea.vmem %s425_s8, 64  ;;  %s2231_s21 = smov [#allocation10]  }
  0xee   : > { %p2076_p8 = scmp.ne.s32.totalorder %s425_s8, %s2075_s22  ;;  %s2080_s9 = sshll.u32 %s2231_s21, 4  ;;  %s2081_s9 = int_to_ptr.vmem [resolvable:$false] %s2080_s9 }
  0xef   : > { %s2082_s1 = scalar_lea.vmem %s2081_s9, 128  ;;  %p2083_p9 = scmp.lt.s32.totalorder %s425_s8, %s2081_s9 }
  0xf0   : > { %p2078_p13 = pnand %p2076_p8, %p2884_p1  ;;  %p2084_p5 = scmp.lt.s32.totalorder %s2082_s1, %s2075_s22 }
  0xf2   : > { %p2079_p0 = pneg %p2078_p13  ;;  %p2085_p6 = por %p2084_p5, %p2083_p9 }
  0xf4   : > { %p2086_p2 = pnand %p2085_p6, %p2079_p0 }
  0xf6   : > { %2089 = shalt.err (!%p2086_p2)
}
  0xf7   : > { %p2886_p7 = scmp.ne.s32.totalorder %s2875_s3, 0  ;;  %p2887_p10 = scmp.ne.s32.totalorder %s2861_s16, 0 }
  0xf8   : > { %s2600_s14 = sand.u32 (!%p2887_p10), 1, %s2204_s10   ;;  %p2888_p1 = scmp.ne.s32.totalorder (!%p2887_p10), %s2869_s17, 0 }
  0xf9   : > { %1746 = dma.hbm_to_vmem [thread:$0]  (!%p2886_p7), %s2576_s28, 64, %s425_s8, %s2453_s29  }
  0xfa   : > { %433 = sbr.rel (%p2887_p10) target bundleno = 1739 (0x6cb), region = 52  ;;  %s2603_s4 = sshll.u32 (!%p2887_p10), %s2600_s14, 2 }
  0xfb   : > { %s436_s24 = scalar_lea.sflag (!%p2887_p10), [#allocation6], %s2600_s14  ;;  %s439_s27 = scalar_lea.vmem (!%p2887_p10), [#allocation5], %s2603_s4 }
 0x101   : > { %2171 = dma.done.wait (%p2888_p1), %s436_s24, 64  }
 0x102   : > { %2173 = vsyncadd (%p2888_p1), %s436_s24, 4294967232  ;;  %s444_s3 = sand.u32 1, %s2324_s15   ;;  %s448_s29 = scalar_lea.vmem [#allocation8], %s2603_s4 }
 0x103   : > { %s445_s16 = scalar_lea.sflag [#allocation9], %s444_s3 }
 0x104   : > { %2175 = dma.done.wait (%p2888_p1), %s445_s16, 128  }
 0x105   : > { %2177 = vsyncadd (%p2888_p1), %s445_s16, 4294967168  ;;  %s457_s18 = scalar_lea.vmem [#allocation10], %s2603_s4  ;;  %p2889_p6 = scmp.eq.s32.totalorder %s2324_s15, 0 }
 0x107   : > { %2179 = dma.done.wait (%p2889_p6), [#allocation12], 384   ;;  %p2890_p4 = pmov %p2889_p6 }
 0x109   : > { %2181 = vsyncadd (%p2890_p4), [#allocation12], 4294966912  ;;  %p2891_p3 = pmov %p2890_p4 }
 0x10b   : > { %2183 = dma.done.wait (%p2891_p3), [#allocation15], 512   ;;  %p2892_p11 = pmov %p2891_p3 }
 0x10c   : > { %p2893_p12 = pmov %p2891_p3 }
 0x10d   : > { %2185 = vsyncadd (%p2892_p11), [#allocation15], 4294966784 }
 0x10e   : > { %2187 = dma.done.wait (%p2893_p12), [#allocation18], 256   ;;  %p2894_p8 = pmov %p2891_p3 }
 0x10f   : > { %v2232_v0 = vmov 0.0   ;;  %vm2233_vm0 = vmmov 0   ;;  %v1830_v1 = vld [vmem:[#allocation14] sm:$0xff]   ;;  %v1831_v2 = vld [vmem:[#allocation14 + $0x8] sm:$0xff]   ;;  %v532_v3 = vld [vmem:[%s448_s29] sm:$0xf] }
 0x110   : > { %2189 = vsyncadd (%p2894_p8), [#allocation18], 4294967040  ;;  %1611 = vmatprep.subr.bf16.mxu0 %v2232_v0  ;;  %1615 = vmatprep.mubr.msk.bf16.mxu0 %vm2233_vm0, %v2232_v0  ;;  %v1832_v4 = vld [vmem:[#allocation13] sm:$0xff]   ;;  %vm549_vm1 = vcmask 261120   ;;  %v1833_v6 = vld [vmem:[#allocation13 + $0x8] sm:$0xff]   ;;  %vm594_vm2 = vcmask 257024  }
 0x111   : > { %1619 = vmatprep.subr.bf16.mxu1 %v2232_v0  ;;  %1623 = vmatprep.mubr.msk.bf16.mxu1 %vm2233_vm0, %v2232_v0  ;;  %v1834_v5 = vld [vmem:[#allocation16] sm:$0xff]   ;;  %v1835_v8 = vld [vmem:[#allocation16 + $0x8] sm:$0xff]   ;;  %v596_v9 = vld [vmem:[%s457_s18] sm:$0xf]  ;;  %vm723_vm3 = vcmask 64512   ;;  %s2234_s15 = smov 112  }
 0x112   : > { %1612 = vmatpush3.bf16.msra.mxu0 %v1830_v1  ;;  %1620 = vmatpush3.bf16.msra.mxu1 %v1834_v5  ;;  %v658_v7 = vld [vmem:[%s439_s27] sm:$0xf]  ;;  %s2235_s17 = smov 120   ;;  %s2236_s19 = smov 104   ;;  %vm787_vm4 = vcmask 1043456   ;;  %v720_v41 = vld [vmem:[#allocation11] sm:$0xff] }
 0x113   : > { %1613 = vmatprep.subr.bf16.mxu0 %v2232_v0  ;;  %1621 = vmatprep.subr.bf16.mxu1 %v2232_v0  ;;  %s1545_s28 = sshll.u32 %s2600_s14, 5  ;;  %s2237_s8 = smov 8   ;;  %vm958_vm5 = vcmask 130112   ;;  %vm1085_vm6 = vcmask 195712   ;;  %vm1212_vm7 = vcmask 261312  }
 0x114   : > { %s2696_s30 = scalar_lea.vmem [#allocation20], %s1545_s28  ;;  %s2238_s26 = smov 16  }
 0x115   : > { %s2239_s13 = smov 24   ;;  %s2895_s20 = sld [smem:[#allocation33_spill]] }
 0x116   : > { %1614 = vmatpush3.bf16.msra.mxu0 %v1831_v2  ;;  %1622 = vmatpush3.bf16.msra.mxu1 %v1835_v8  ;;  %s1582_s23 = sshll.u32 %s2212_s12, 9  ;;  %s1310_s5 = sshll.u32 %s2696_s30, 4  ;;  %s2733_s5 = int_to_ptr.vmem [resolvable:$true] %s1310_s5 }
 0x117   : > { %1627 = vmatprep.subr.bf16.mxu0 %v2232_v0  ;;  %1635 = vmatprep.subr.bf16.mxu1 %v2232_v0  ;;  %s2896_s21 = sld [smem:[#allocation41_spill]]  ;;  %s1282_s1 = scalar_lea.sflag [#allocation21], %s2600_s14 }
 0x118   : > { %s2090_s4 = scalar_lea.vmem %s2733_s5, 512  ;;  %s2240_s24 = smov [#allocation20]  }
 0x119   : > { %1616 = vmatmul.mubr.msk.bf16.vlgmr.msra.gmra.mrb[0].mxu0 %vm549_vm1, %v532_v3  ;;  %1624 = vmatmul.mubr.msk.bf16.vlgmr.msra.gmra.mrb[0].mxu1 %vm549_vm1, %v596_v9  ;;  %p2091_p13 = scmp.ne.s32.totalorder %s2733_s5, %s2090_s4  ;;  %s2094_s27 = sshll.u32 %s2240_s24, 4  ;;  %s2095_s27 = int_to_ptr.vmem [resolvable:$false] %s2094_s27 }
 0x11a   : > { %1628 = vmatpush3.bf16.msra.mxu0 %v1832_v4  ;;  %1631 = vmatprep.mubr.msk.bf16.mxu0 %vm2233_vm0, %v2232_v0  ;;  %s2096_s3 = scalar_lea.vmem %s2095_s27, 1024  ;;  %p2097_p2 = scmp.lt.s32.totalorder %s2733_s5, %s2095_s27 }
 0x11b   : > { %1629 = vmatprep.subr.bf16.mxu0 %v2232_v0  ;;  %1637 = vmatprep.mubr.msk.bf16.mxu1 %vm2233_vm0, %v2232_v0  ;;  %p2897_p0 = scmp.ne.s32.totalorder %s2895_s20, 0  ;;  %p2098_p7 = scmp.lt.s32.totalorder %s2096_s3, %s2090_s4 }
 0x11d   : > { %s2731_s9 = scalar_lea.hbm %s2896_s21, %s1582_s23  ;;  %p2092_p9 = pnand %p2091_p13, %p2897_p0 }
 0x11e   : > { %1630 = vmatpush3.bf16.msra.mxu0 %v1833_v6  ;;  %p2099_p10 = por %p2098_p7, %p2097_p2 }
 0x11f   : > { %1641 = vmatprep.subr.bf16.mxu0 %v2232_v0  ;;  %p2093_p5 = pneg %p2092_p9 }
 0x121   : > { %1632 = vmatmul.mubr.msk.bf16.vlgmr.msra.gmra.mrb[4].mxu0 %vm549_vm1, %v658_v7  ;;  %p2100_p1 = pnand %p2099_p10, %p2093_p5 }
 0x122   : > { %1643 = vmatprep.mubr.msk.bf16.mxu0 %vm2233_vm0, %v2232_v0 }
 0x1ec   : > { %v587_v10 = vpop.f32.mrb[0].mxu0  ;;  %v650_v25 = vpop.f32.mrb[0].mxu1 }
 0x1ed   : > { %v593_v11 = vpack.c.bf16 %v587_v10, %v587_v10  ;;  %v1617_v12 = vpop.f32.mrb[1].mxu0  ;;  %v656_v26 = vpack.c.bf16 %v650_v25, %v650_v25  ;;  %v1625_v27 = vpop.f32.mrb[1].mxu1 }
 0x1ee   : > { %v590_v13 = vpop.f32.mrb[2].mxu0  ;;  %v653_v28 = vpop.f32.mrb[2].mxu1 }
 0x1ef   : > { %595 = vst.msk [vmem:[#allocation2] sm:$0xf] %vm594_vm2, %v593_v11  ;;  %v1618_v14 = vpop.f32.mrb[3].mxu0  ;;  %657 = vst.msk [vmem:[#allocation3] sm:$0xf] %vm594_vm2, %v656_v26  ;;  %v1626_v29 = vpop.f32.mrb[3].mxu1 }
 0x1f4   : > { %v713_v15 = vpop.f32.mrb[4].mxu0 }
 0x1f5   : > { %v1633_v16 = vpop.f32.mrb[5].mxu0  ;;  %v719_v22 = vpack.c.bf16 %v713_v15, %v713_v15 }
 0x1f6   : > { %v721_v17 = vld [vmem:[#allocation2] sm:$0xf]  ;;  %v716_v21 = vpop.f32.mrb[6].mxu0  ;;  %v722_v30 = vld [vmem:[#allocation3] sm:$0xf] }
 0x1f7   : > { %v1836_v18 = vld [vmem:[#allocation2] ss:$0 sps:$4 sm:$0xff]   ;;  %v728_v19 = vsel %vm723_vm3, %v721_v17, 0  ;;  %v1634_v23 = vpop.f32.mrb[7].mxu0  ;;  %v789_v31 = vsel %vm787_vm4, %v722_v30, 0 }
 0x1f8   : > { %v1837_v20 = vld [vmem:[#allocation2] ss:$0 sps:$4 sm:$0xff]   ;;  %1636 = vmatpush3.bf16.xpose.msra.mxu1 %v728_v19  ;;  %967 = vrot.lane.b32.xlu1 %v1836_v18, %s2234_s15  ;;  %v1839_v8 = vld [vmem:[#allocation3] ss:$0 sps:$4 sm:$0xff]  }
 0x1f9   : > { %840 = vrot.lane.b32.xlu0 %v1837_v20, %s2235_s17  ;;  %1647 = vmatprep.subr.bf16.mxu1 %v2232_v0  ;;  %v1838_v24 = vld [vmem:[#allocation2] ss:$0 sps:$4 sm:$0xff]   ;;  %v1841_v28 = vld [vmem:[#allocation3] ss:$0 sps:$4 sm:$0xff]  }
 0x1fa   : > { %1642 = vmatpush3.bf16.msra.mxu0 %v789_v31 }
 0x1fb   : > { %1653 = vmatprep.subr.bf16.mxu0 %v2232_v0 }
 0x1fc   : > { %962 = vrot.lane.b32.xlu1 %v719_v22, %s2234_s15 }
 0x1fd   : > { %835 = vrot.lane.b32.xlu0 %v719_v22, %s2235_s17 }
 0x1ff   : > { %1638 = vmatmul.mubr.msk.bf16.vlgmr.msra.gmra.mrb[4].mxu1 %vm723_vm3, %v719_v22 }
 0x200   : > { %1089 = vrot.lane.b32.xlu1 %v719_v22, %s2236_s19  ;;  %1649 = vmatprep.mubr.msk.bf16.mxu1 %vm2233_vm0, %v2232_v0 }
 0x201   : > { %1094 = vrot.lane.b32.xlu0 %v1838_v24, %s2236_s19  ;;  %v1840_v24 = vld [vmem:[#allocation3] ss:$0 sps:$4 sm:$0xff]  }
 0x26a   : > { %v968_v34 = vpop.permute.xlu1 %967 }
 0x26b   : > { %v841_v32 = vpop.permute.xlu0 %840  ;;  %v973_v36 = vsel %vm723_vm3, %v968_v34, 0 }
 0x26c   : > { %v846_v33 = vsel %vm723_vm3, %v841_v32, 0 }
 0x26d   : > { %1648 = vmatpush3.bf16.xpose.msra.mxu1 %v846_v33 }
 0x26e   : > { %1659 = vmatprep.subr.bf16.mxu1 %v2232_v0  ;;  %v963_v38 = vpop.permute.xlu1 %962 }
 0x26f   : > { %v836_v35 = vpop.permute.xlu0 %835 }
 0x272   : > { %v1090_v40 = vpop.permute.xlu1 %1089 }
 0x273   : > { %v1095_v37 = vpop.permute.xlu0 %1094 }
 0x274   : > { %1650 = vmatmul.mubr.msk.bf16.vlgmr.msra.gmra.mrb[8].mxu1 %vm723_vm3, %v836_v35  ;;  %v1100_v39 = vsel %vm723_vm3, %v1095_v37, 0 }
 0x275   : > { %1660 = vmatpush3.bf16.xpose.msra.mxu1 %v973_v36  ;;  %1661 = vmatprep.mubr.msk.bf16.mxu1 %vm2233_vm0, %v2232_v0 }
 0x276   : > { %1671 = vmatprep.subr.bf16.mxu1 %v2232_v0 }
 0x27c   : > { %1662 = vmatmul.mubr.msk.bf16.vlgmr.msra.gmra.mrb[12].mxu1 %vm723_vm3, %v963_v38 }
 0x27d   : > { %1672 = vmatpush3.bf16.xpose.msra.mxu1 %v1100_v39  ;;  %1673 = vmatprep.mubr.msk.bf16.mxu1 %vm2233_vm0, %v2232_v0 }
 0x27e   : > { %1683 = vmatprep.subr.bf16.mxu1 %v2232_v0 }
 0x284   : > { %1674 = vmatmul.mubr.msk.bf16.vlgmr.msra.gmra.mrb[16].mxu1 %vm723_vm3, %v1090_v40 }
 0x285   : > { %1687 = vmatprep.mubr.msk.bf16.mxu1 %vm2233_vm0, %v2232_v0 }
 0x2d2   : > { %v764_v42 = vpop.f32.mrb[4].mxu1 }
 0x2d3   : > { %v765_v43 = vadd.f32 %v764_v42, %v720_v41  ;;  %v1639_v44 = vpop.f32.mrb[5].mxu1 }
 0x2d4   : > { %v767_v45 = vpop.f32.mrb[6].mxu1 }
 0x2d5   : > { %v1640_v46 = vpop.f32.mrb[7].mxu1  ;;  %v770_v47 = vsel %vm723_vm3, %v765_v43, -inf }
 0x2d6   : > { %771 = vmax.xlane.f32.xlu0 %v770_v47 }
 0x347   : > { %v882_v48 = vpop.f32.mrb[8].mxu1 }
 0x348   : > { %v883_v49 = vadd.f32 %v882_v48, %v720_v41  ;;  %v1651_v50 = vpop.f32.mrb[9].mxu1 }
 0x349   : > { %v885_v51 = vpop.f32.mrb[10].mxu1 }
 0x34a   : > { %v1652_v52 = vpop.f32.mrb[11].mxu1  ;;  %v888_v53 = vsel %vm723_vm3, %v883_v49, -inf }
 0x34b   : > { %889 = vmax.xlane.f32.xlu1 %v888_v53 }
 0x34f   : > { %v1009_v54 = vpop.f32.mrb[12].mxu1 }
 0x350   : > { %v1010_v55 = vadd.f32 %v1009_v54, %v720_v41  ;;  %v1663_v56 = vpop.f32.mrb[13].mxu1 }
 0x351   : > { %v1012_v57 = vpop.f32.mrb[14].mxu1  ;;  %v1842_v56 = vld [vmem:[#allocation17] sm:$0xff]  }
 0x352   : > { %v1664_v58 = vpop.f32.mrb[15].mxu1  ;;  %v1015_v59 = vsel %vm723_vm3, %v1010_v55, -inf  ;;  %1684 = vmatpush3.bf16.msra.mxu1 %v1842_v56  ;;  %v1843_v57 = vld [vmem:[#allocation17 + $0x8] sm:$0xff]  }
 0x353   : > { %1016 = vmax.xlane.f32.xlu0 %v1015_v59  ;;  %1685 = vmatprep.subr.bf16.mxu1 %v2232_v0 }
 0x356   : > { %1686 = vmatpush3.bf16.msra.mxu1 %v1843_v57 }
 0x357   : > { %v1136_v60 = vpop.f32.mrb[16].mxu1 }
 0x358   : > { %v1137_v61 = vadd.f32 %v1136_v60, %v720_v41  ;;  %v1675_v62 = vpop.f32.mrb[17].mxu1 }
 0x359   : > { %v1139_v63 = vpop.f32.mrb[18].mxu1 }
 0x35a   : > { %v1676_v1 = vpop.f32.mrb[19].mxu1  ;;  %v1142_v2 = vsel %vm723_vm3, %v1137_v61, -inf }
 0x35b   : > { %1143 = vmax.xlane.f32.xlu0 %v1142_v2 }
 0x363   : > { %v772_v3 = vpop.xlane.xlu0 %771 }
 0x364   : > { %v773_v4 = vsub.f32 %v765_v43, %v772_v3 }
 0x366   : > { %v774_v5 = vmul.f32 1.442695, %v773_v4 }
 0x368   : > { %1844 = vpow2.f32 %v774_v5 }
 0x372   : > { %v1845_v6 = vpop.eup %1844 }
 0x373   : > { %v776_v7 = vsel %vm723_vm3, %v1845_v6, 0.0 }
 0x374   : > { %777 = vadd.xlane.f32.xlu1 %v776_v7 }
 0x385   : > { %906 = vrot.lane.b32.xlu1 %v1839_v8, %s2235_s17 }
 0x3d8   : > { %v890_v9 = vpop.xlane.xlu1 %889 }
 0x3d9   : > { %v891_v10 = vsub.f32 %v883_v49, %v890_v9 }
 0x3db   : > { %v892_v11 = vmul.f32 1.442695, %v891_v10 }
 0x3dd   : > { %1846 = vpow2.f32 %v892_v11 }
 0x3e0   : > { %v1017_v12 = vpop.xlane.xlu0 %1016 }
 0x3e1   : > { %v1018_v13 = vsub.f32 %v1010_v55, %v1017_v12 }
 0x3e3   : > { %v1019_v14 = vmul.f32 1.442695, %v1018_v13 }
 0x3e5   : > { %1848 = vpow2.f32 %v1019_v14 }
 0x3e7   : > { %v1847_v15 = vpop.eup %1846 }
 0x3e8   : > { %v1144_v16 = vpop.xlane.xlu0 %1143  ;;  %v894_v17 = vsel %vm723_vm3, %v1847_v15, 0.0 }
 0x3e9   : > { %v1145_v18 = vsub.f32 %v1137_v61, %v1144_v16  ;;  %895 = vadd.xlane.f32.xlu0 %v894_v17 }
 0x3eb   : > { %v1146_v19 = vmul.f32 1.442695, %v1145_v18 }
 0x3ed   : > { %1850 = vpow2.f32 %v1146_v19 }
 0x3ef   : > { %v1849_v20 = vpop.eup %1848 }
 0x3f0   : > { %v1021_v21 = vsel %vm723_vm3, %v1849_v20, 0.0 }
 0x3f1   : > { %1022 = vadd.xlane.f32.xlu1 %v1021_v21 }
 0x3f7   : > { %v1851_v22 = vpop.eup %1850 }
 0x3f8   : > { %v1148_v23 = vsel %vm723_vm3, %v1851_v22, 0.0 }
 0x3f9   : > { %1149 = vadd.xlane.f32.xlu0 %v1148_v23 }
 0x401   : > { %v778_v25 = vpop.xlane.xlu1 %777 }
 0x402   : > { %1852 = vrcp.f32 %v778_v25  ;;  %1160 = vrot.lane.b32.xlu1 %v1840_v24, %s2236_s19 }
 0x405   : > { %v907_v29 = vpop.permute.xlu1 %906 }
 0x406   : > { %v912_v31 = vsel %vm787_vm4, %v907_v29, 0 }
 0x40c   : > { %v1853_v26 = vpop.eup %1852 }
 0x40d   : > { %v781_v27 = vmul.f32 %v1853_v26, %v1845_v6 }
 0x40f   : > { %782 = vst.msk [vmem:[%s2696_s30] sm:$0xff] %vm723_vm3, %v781_v27  ;;  %1033 = vrot.lane.b32.xlu0 %v1841_v28, %s2234_s15  ;;  %v783_v30 = vpack.c.bf16 %v781_v27, %v781_v27 }
 0x411   : > { %1644 = vmatmul.mubr.msk.bf16.vlgmr.msra.gmra.mrb[8].mxu0 %vm723_vm3, %v783_v30 }
 0x412   : > { %1654 = vmatpush3.bf16.msra.mxu0 %v912_v31  ;;  %1655 = vmatprep.mubr.msk.bf16.mxu0 %vm2233_vm0, %v2232_v0 }
 0x413   : > { %1665 = vmatprep.subr.bf16.mxu0 %v2232_v0 }
 0x476   : > { %v896_v32 = vpop.xlane.xlu0 %895 }
 0x477   : > { %1854 = vrcp.f32 %v896_v32 }
 0x47e   : > { %v1023_v33 = vpop.xlane.xlu1 %1022 }
 0x47f   : > { %1856 = vrcp.f32 %v1023_v33 }
 0x481   : > { %v1855_v34 = vpop.eup %1854 }
 0x482   : > { %v899_v35 = vmul.f32 %v1855_v34, %v1847_v15  ;;  %v1161_v42 = vpop.permute.xlu1 %1160 }
 0x483   : > { %v1166_v44 = vsel %vm787_vm4, %v1161_v42, 0 }
 0x484   : > { %1559 = vst.msk [vmem:[%s2696_s30 + $0x8] sm:$0xff] %vm723_vm3, %v899_v35  ;;  %v902_v36 = vpack.c.bf16 %v899_v35, %v899_v35 }
 0x486   : > { %1656 = vmatmul.mubr.msk.bf16.vlgmr.msra.gmra.mrb[12].mxu0 %vm723_vm3, %v902_v36  ;;  %v1150_v37 = vpop.xlane.xlu0 %1149 }
 0x487   : > { %1858 = vrcp.f32 %v1150_v37  ;;  %1667 = vmatprep.mubr.msk.bf16.mxu0 %vm2233_vm0, %v2232_v0 }
 0x489   : > { %v1857_v38 = vpop.eup %1856 }
 0x48a   : > { %v1026_v39 = vmul.f32 %v1857_v38, %v1849_v20  ;;  %v1034_v40 = vpop.permute.xlu0 %1033 }
 0x48b   : > { %v1039_v41 = vsel %vm787_vm4, %v1034_v40, 0 }
 0x48c   : > { %1564 = vst.msk [vmem:[%s2696_s30 + $0x10] sm:$0xff] %vm723_vm3, %v1026_v39  ;;  %1666 = vmatpush3.bf16.msra.mxu0 %v1039_v41  ;;  %v1029_v43 = vpack.c.bf16 %v1026_v39, %v1026_v39 }
 0x48d   : > { %1677 = vmatprep.subr.bf16.mxu0 %v2232_v0 }
 0x48f   : > { %1668 = vmatmul.mubr.msk.bf16.vlgmr.msra.gmra.mrb[16].mxu0 %vm723_vm3, %v1029_v43 }
 0x490   : > { %1678 = vmatpush3.bf16.msra.mxu0 %v1166_v44  ;;  %1679 = vmatprep.mubr.msk.bf16.mxu0 %vm2233_vm0, %v2232_v0 }
 0x491   : > { %v1859_v45 = vpop.eup %1858 }
 0x492   : > { %v1153_v46 = vmul.f32 %v1859_v45, %v1851_v22 }
 0x494   : > { %1569 = vst.msk [vmem:[%s2696_s30 + $0x18] sm:$0xff] %vm723_vm3, %v1153_v46  ;;  %v1156_v47 = vpack.c.bf16 %v1153_v46, %v1153_v46 }
 0x497   : > { %1680 = vmatmul.mubr.msk.bf16.vlgmr.msra.gmra.mrb[20].mxu0 %vm723_vm3, %v1156_v47 }
 0x4e4   : > { %v825_v48 = vpop.f32.mrb[8].mxu0 }
 0x4e5   : > { %831 = vst.msk [vmem:[#allocation4] sm:$0xff] %vm723_vm3, %v825_v48  ;;  %v1645_v49 = vpop.f32.mrb[9].mxu0 }
 0x4e6   : > { %v828_v50 = vpop.f32.mrb[10].mxu0 }
 0x4e7   : > { %v1646_v51 = vpop.f32.mrb[11].mxu0 }
 0x559   : > { %v948_v52 = vpop.f32.mrb[12].mxu0 }
 0x55a   : > { %955 = vrot.lane.b32.xlu1 %v948_v52, %s2237_s8  ;;  %v1657_v53 = vpop.f32.mrb[13].mxu0 }
 0x55b   : > { %v951_v54 = vpop.f32.mrb[14].mxu0 }
 0x55c   : > { %v1658_v55 = vpop.f32.mrb[15].mxu0 }
 0x562   : > { %v1075_v58 = vpop.f32.mrb[16].mxu0 }
 0x563   : > { %1082 = vrot.lane.b32.xlu0 %v1075_v58, %s2238_s26  ;;  %v1669_v59 = vpop.f32.mrb[17].mxu0 }
 0x564   : > { %v1078_v60 = vpop.f32.mrb[18].mxu0 }
 0x565   : > { %v1670_v61 = vpop.f32.mrb[19].mxu0 }
 0x56a   : > { %v1202_v62 = vpop.f32.mrb[20].mxu0 }
 0x56b   : > { %1209 = vrot.lane.b32.xlu1 %v1202_v62, %s2239_s13  ;;  %v1681_v63 = vpop.f32.mrb[21].mxu0 }
 0x56c   : > { %v1205_v1 = vpop.f32.mrb[22].mxu0 }
 0x56d   : > { %v1682_v2 = vpop.f32.mrb[23].mxu0 }
 0x5cc   : > { %v956_v3 = vpop.permute.xlu1 %955 }
 0x5cd   : > { %959 = vst.msk [vmem:[#allocation4] sm:$0xff] %vm958_vm5, %v956_v3 }
 0x5d5   : > { %v1083_v0 = vpop.permute.xlu0 %1082 }
 0x5d6   : > { %1086 = vst.msk [vmem:[#allocation4] sm:$0xff] %vm1085_vm6, %v1083_v0 }
 0x5dd   : > { %v1210_v4 = vpop.permute.xlu1 %1209 }
 0x5de   : > { %1213 = vst.msk [vmem:[#allocation4] sm:$0xff] %vm1212_vm7, %v1210_v4 }
 0x5e5   : > { %v1214_v5 = vld [vmem:[#allocation4] sm:$0xff] }
 0x5e6   : > { %v1215_v6 = vpack.c.bf16 %v1214_v5, %v1214_v5 }
 0x5e8   : > { %1688 = vmatmul.mubr.msk.bf16.vlgmr.msra.gmra.mrb[20].mxu1 %vm549_vm1, %v1215_v6 }
 0x5e9   : > { %2103 = shalt.err (!%p2100_p1)
}
 0x5ea   : > { %s2104_s16 = scalar_lea.hbm %s2731_s9, 512  ;;  %s2108_s15 = scalar_lea.hbm %s2896_s21, 1024 }
 0x5eb   : > { %p2105_p6 = scmp.ne.s32.totalorder %s2731_s9, %s2104_s16  ;;  %p2109_p11 = scmp.lt.u32.totalorder %s2731_s9, %s2896_s21 }
 0x5ec   : > { %p2110_p12 = scmp.lt.u32.totalorder %s2108_s15, %s2104_s16  ;;  %p2112_p13 = scmp.lt.u32.totalorder %s2104_s16, %s2731_s9 }
 0x5ed   : > { %p2106_p4 = pnand %p2105_p6, %p2897_p0 }
 0x5ee   : > { %p2111_p8 = por %p2110_p12, %p2109_p11 }
 0x5ef   : > { %p2107_p3 = pneg %p2106_p4 }
 0x5f0   : > { %p2113_p9 = por %p2112_p13, %p2111_p8 }
 0x5f2   : > { %p2114_p5 = pnand %p2113_p9, %p2107_p3 }
 0x5f4   : > { %2117 = shalt.err (!%p2114_p5)
}
 0x5f5   : > { %s2241_s28 = smov 128   ;;  %s1544_s30 = sshll.u32 %s2600_s14, 3 }
 0x5f6   : > { %1718 = dma.vmem_to_hbm [thread:$0]  (%p2897_p0), %s2733_s5, 512, %s2731_s9, %s1282_s1, %s2241_s28, %s2241_s28, %s2237_s8  }
 0x5f7   : > { %s1577_s26 = sshll.u32 %s2212_s12, 7  ;;  %s519_s13 = scalar_lea.vmem [#allocation19], %s1544_s30 }
 0x5f8   : > { %s1296_s23 = sshll.u32 %s519_s13, 4  ;;  %s2898_s4 = sld [smem:[#allocation40_spill]]  ;;  %s2767_s23 = int_to_ptr.vmem [resolvable:$true] %s1296_s23 }
 0x5f9   : > { %s1277_s8 = scalar_lea.sflag [#allocation7], %s2600_s14  ;;  %s2118_s5 = scalar_lea.vmem %s2767_s23, 128 }
 0x5fa   : > { %p2119_p2 = scmp.ne.s32.totalorder %s2767_s23, %s2118_s5  ;;  %s2242_s12 = smov [#allocation19]  }
 0x5fb   : > { %s2122_s9 = sshll.u32 %s2242_s12, 4  ;;  %s2123_s9 = int_to_ptr.vmem [resolvable:$false] %s2122_s9 }
 0x5fc   : > { %p2120_p7 = pnand %p2119_p2, %p2897_p0  ;;  %s2124_s1 = scalar_lea.vmem %s2123_s9, 256 }
 0x5fd   : > { %p2125_p1 = scmp.lt.s32.totalorder %s2767_s23, %s2123_s9  ;;  %p2126_p6 = scmp.lt.s32.totalorder %s2124_s1, %s2118_s5 }
 0x5fe   : > { %s2765_s24 = scalar_lea.hbm %s2898_s4, %s1577_s26  ;;  %p2121_p10 = pneg %p2120_p7 }
 0x5ff   : > { %p2127_p4 = por %p2126_p6, %p2125_p1 }
 0x601   : > { %p2128_p3 = pnand %p2127_p4, %p2121_p10 }
 0x6bb   : > { %v1269_v7 = vpop.f32.mrb[20].mxu1 }
 0x6bc   : > { %1275 = vst.msk [vmem:[%s519_s13] sm:$0xff] %vm549_vm1, %v1269_v7  ;;  %v1689_v8 = vpop.f32.mrb[21].mxu1 }
 0x6bd   : > { %v1272_v9 = vpop.f32.mrb[22].mxu1 }
 0x6be   : > { %2131 = shalt.err (!%p2128_p3)
}
 0x6bf   : > { %s2132_s14 = scalar_lea.hbm %s2765_s24, 128  ;;  %s2136_s16 = scalar_lea.hbm %s2898_s4, 256 }
 0x6c0   : > { %p2133_p11 = scmp.ne.s32.totalorder %s2765_s24, %s2132_s14  ;;  %p2137_p13 = scmp.lt.u32.totalorder %s2765_s24, %s2898_s4 }
 0x6c1   : > { %p2138_p9 = scmp.lt.u32.totalorder %s2136_s16, %s2132_s14  ;;  %p2140_p2 = scmp.lt.u32.totalorder %s2132_s14, %s2765_s24 }
 0x6c2   : > { %p2134_p12 = pnand %p2133_p11, %p2897_p0 }
 0x6c3   : > { %p2139_p5 = por %p2138_p9, %p2137_p13 }
 0x6c4   : > { %p2135_p8 = pneg %p2134_p12 }
 0x6c5   : > { %p2141_p7 = por %p2140_p2, %p2139_p5 }
 0x6c7   : > { %p2142_p10 = pnand %p2141_p7, %p2135_p8 }
 0x6c9   : > { %2145 = shalt.err (!%p2142_p10)
}
 0x6ca   : > { %1717 = dma.vmem_to_hbm [thread:$0]  (%p2897_p0), %s2767_s23, 128, %s2765_s24, %s1277_s8   ;;  %v1690_v10 = vpop.f32.mrb[23].mxu1 }
 0x6cb PF: > { %s2899_s15 = sld [smem:[#allocation29_spill]]  ;;  %s2900_s17 = sld [smem:[#allocation35_spill]] }
 0x6cc   : > { %s2901_s19 = sld [smem:[#allocation31_spill]] }
 0x6d1   : > { %s1325_s28 = sand.u32 1, %s2899_s15   ;;  %p2902_p1 = scmp.ne.s32.totalorder %s2900_s17, 0 }
 0x6d2   : > { %p2903_p6 = scmp.ge.s32.totalorder %s2901_s19, 2  ;;  %s1326_s30 = scalar_lea.sflag [#allocation7], %s1325_s28 }
 0x6d4   : > { %p1748_p4 = pnand %p2903_p6, %p2902_p1 }
 0x6d6   : > { %2191 = dma.done.wait (!%p1748_p4), %s1326_s30, 128  }
 0x6d7   : > { %2193 = vsyncadd (!%p1748_p4), %s1326_s30, 4294967168  ;;  %s1335_s26 = scalar_lea.sflag [#allocation21], %s1325_s28 }
 0x6d8   : > { %2195 = dma.done.wait (!%p1748_p4), %s1335_s26, 512  }
 0x6d9   : > { %2197 = vsyncadd (!%p1748_p4), %s1335_s26, 4294966784  ;;  %s35_s14 = sadd.s32 1, %s2901_s19   ;;  %s2904_s20 = sld [smem:[#allocation34_spill]] }
 0x6da   : > { %p32_p3 = scmp.ge.s32.totalorder %s35_s14, 4   ;;  %s2905_s12 = sld [smem:[#allocation30_spill]] }
 0x6db   : > { %s2906_s13 = sld [smem:[#allocation32_spill]]  ;;  %s2907_s30 = smov %s2204_s10 }
 0x6dc   : > { %s2908_s10 = smov %s2208_s11  ;;  %34 = sbr.rel (!%p32_p3) target bundleno = 20 (0x14), region = 166 }
 0x6df   : > { %s2909_s11 = smov %s2904_s20 }
 0x6e3   :  { %1340 = vsyncpa [#allocation6], 1 }
 0x6e4   :  { %1342 = vsyncpa [#allocation6 + $0x1], 1 }
 0x6e5   :  { %1343 = vsyncpa [#allocation9], 1 }
 0x6e6   :  { %1345 = vsyncpa [#allocation9 + $0x1], 1 }
 0x6e7   :  { %1346 = vsyncpa [#allocation12], 1 }
 0x6e8   :  { %1347 = vsyncpa [#allocation15], 1 }
 0x6e9   :  { %1348 = vsyncpa [#allocation18], 1 }
 0x6ea   :  { %1349 = vsyncpa [#allocation7], 1 }
 0x6eb   :  { %1351 = vsyncpa [#allocation7 + $0x1], 1 }
 0x6ec   :  { %1352 = vsyncpa [#allocation21], 1 }
 0x6ed   :  { %1354 = vsyncpa [#allocation21 + $0x1], 1 }

</bundles_post_ra>
